<compile_context>
chip_gen: v7x
topology: tpu7x:2x2x1
jax: 0.10.0
libtpu: 0.0.40
codegen_flags: <defaults>
</compile_context>

<pallas_src>
import functools

import jax
import jax.numpy as jnp
from jax.experimental import pallas as pl
from jax.experimental.pallas import tpu as pltpu


# ----------------------------------------------------------------------------
# Pallas kernels
# ----------------------------------------------------------------------------
def proj_kernel(x_ref, w_ref, b_ref, o_ref):
    """gates_x = x @ W_ih + b, one big parallel matmul (M = T*B rows)."""
    acc = jnp.dot(x_ref[...].astype(jnp.bfloat16), w_ref[...],
                  preferred_element_type=jnp.float32)
    o_ref[...] = (acc + b_ref[...]).astype(o_ref.dtype)


def lstm_stack_kernel(maxlen_ref, gx0_ref, wih_ref, whh_ref, b_ref, len_ref,
                      y_ref, h_sc, c_sc, *, num_layers, hidden_size,
                      time_chunk):
    """All LSTM layers fused; grid axis 0 = time chunks (sequential)."""
    c_idx = pl.program_id(0)
    chunk_start = c_idx * time_chunk
    H = hidden_size
    L = num_layers
    B = h_sc.shape[1]

    @pl.when(c_idx == 0)
    def _init():
        h_sc[...] = jnp.zeros_like(h_sc)
        c_sc[...] = jnp.zeros_like(c_sc)

    max_len = maxlen_ref[0]

    # Dead-chunk skip: chunks entirely past max(lengths) only write zeros
    # (padded positions must still be exactly zero in the output).
    @pl.when(chunk_start >= max_len)
    def _pad_only():
        y_ref[...] = jnp.zeros_like(y_ref)

    @pl.when(chunk_start < max_len)
    def _compute():
        # Hoist loads / broadcasts out of the time loop (JAX does not CSE
        # broadcast_in_dim).
        lens = len_ref[...]                                   # (B, 1) int32
        whh = [whh_ref[l] for l in range(L)]                  # bf16 (H, 4H)
        wih = [wih_ref[l] for l in range(L - 1)]              # bf16 (H, 4H)
        bias = [jnp.broadcast_to(b_ref[l], (B, 4 * H)) for l in range(L - 1)]

        def cell(gates, c_prev):
            # Gate columns pre-reordered to [i, f, o, g]: one contiguous
            # sigmoid over 3H, one tanh over H (2 EUP pushes instead of 4).
            ifo = jax.nn.sigmoid(gates[:, :3 * H])
            g_g = jnp.tanh(gates[:, 3 * H:])
            c_new = ifo[:, H:2 * H] * c_prev + ifo[:, :H] * g_g
            h_new = ifo[:, 2 * H:3 * H] * jnp.tanh(c_new)
            return h_new, c_new

        def step(tt, carry):
            hs, cs = carry
            # Pre-issue ALL layers' recurrent matmuls at the top of the
            # timestep (their operands are t-1 state, already available) so
            # MXU push/drain hides under lower layers' EUP/VPU work.
            rec = [jnp.dot(hs[l].astype(jnp.bfloat16), whh[l],
                           preferred_element_type=jnp.float32)
                   for l in range(L)]
            gx_t = gx0_ref[tt].astype(jnp.float32)            # (B, 4H)
            new_h, new_c = [], []
            inp = None
            for l in range(L):
                if l == 0:
                    # layer-0 input projection was hoisted into gx0
                    gates = gx_t + rec[0]
                else:
                    gates = (jnp.dot(inp.astype(jnp.bfloat16), wih[l - 1],
                                     preferred_element_type=jnp.float32)
                             + rec[l] + bias[l - 1])
                h_new, c_new = cell(gates, cs[l])
                new_h.append(h_new)
                new_c.append(c_new)
                inp = h_new
            # Fused padding mask on the final layer's output store.
            t_global = chunk_start + tt
            y_ref[tt] = jnp.where(t_global < lens, inp, 0.0).astype(y_ref.dtype)
            return tuple(new_h), tuple(new_c)

        # State carried in locals / loop carry (vregs) within the chunk; the
        # VMEM scratch is only read once per chunk and written once at the end.
        carry0 = (tuple(h_sc[l] for l in range(L)),
                  tuple(c_sc[l] for l in range(L)))
        if time_chunk <= 8:
            # small chunk: fully static unroll (best LLO visibility)
            carry = carry0
            for tt in range(time_chunk):
                carry = step(tt, carry)
            hs, cs = carry
        else:
            # larger chunk: fori_loop bounds live ranges (avoid vreg spills)
            unroll = next(u for u in (8, 4, 2, 1) if time_chunk % u == 0)
            hs, cs = jax.lax.fori_loop(0, time_chunk, step, carry0,
                                       unroll=unroll)
        for l in range(L):
            h_sc[l] = hs[l]
            c_sc[l] = cs[l]


# ----------------------------------------------------------------------------
# Wrappers around pallas_call
# ----------------------------------------------------------------------------
def _pick_row_tile(m):
    # TODO(synk): for very large D/4H on v7x (64 MiB VMEM), cap this lower or
    #             tile the N dimension and set vmem_limit_bytes explicitly.
    for cand in (512, 256, 128, 64, 32, 16, 8):
        if m % cand == 0:
            return cand
    return m          # full extent (always legal)


def _pick_time_chunk(t):
    if t <= 32:
        return t      # whole sequence in a single grid step
    for cand in (32, 16, 8):
        if t % cand == 0:
            return cand
    return t          # single chunk; fori_loop path bounds live ranges


def run_input_projection(x2d, w_ih_bf16, b):
    """x2d: (M, D) f32.  Returns (M, 4H) bf16 = x2d @ W_ih + b."""
    m, d = x2d.shape
    g = w_ih_bf16.shape[1]
    tm = _pick_row_tile(m)
    return pl.pallas_call(
        proj_kernel,
        out_shape=jax.ShapeDtypeStruct((m, g), jnp.bfloat16),
        grid=(m // tm,),
        in_specs=[pl.BlockSpec((tm, d), lambda i: (i, 0)),
                  pl.BlockSpec((d, g), lambda i: (0, 0)),
                  pl.BlockSpec((1, g), lambda i: (0, 0))],
        out_specs=pl.BlockSpec((tm, g), lambda i: (i, 0)),
        compiler_params=pltpu.CompilerParams(
            dimension_semantics=("parallel",)),
    )(x2d, w_ih_bf16, b)


def run_lstm_stack(max_len, gx0, w_ih_rest, w_hh_all, b_rest, lens2d, *,
                   num_layers, hidden_size):
    """gx0: (T, B, 4H) bf16 time-major precomputed layer-0 input gates.

    Returns (T, B, H) f32, padding positions zeroed."""
    T, B, G = gx0.shape
    H = hidden_size
    L = num_layers
    tc = _pick_time_chunk(T)
    assert T % tc == 0
    kernel = functools.partial(lstm_stack_kernel, num_layers=L,
                               hidden_size=H, time_chunk=tc)
    return pl.pallas_call(
        kernel,
        out_shape=jax.ShapeDtypeStruct((T, B, H), jnp.float32),
        grid_spec=pltpu.PrefetchScalarGridSpec(
            num_scalar_prefetch=1,            # max_len -> SMEM
            grid=(T // tc,),
            in_specs=[
                pl.BlockSpec((tc, B, G), lambda c, ml: (c, 0, 0)),    # gx0
                pl.BlockSpec(w_ih_rest.shape, lambda c, ml: (0, 0, 0)),
                pl.BlockSpec(w_hh_all.shape, lambda c, ml: (0, 0, 0)),
                pl.BlockSpec(b_rest.shape, lambda c, ml: (0, 0, 0)),
                pl.BlockSpec(lens2d.shape, lambda c, ml: (0, 0)),     # lengths
            ],
            out_specs=pl.BlockSpec((tc, B, H), lambda c, ml: (c, 0, 0)),
            scratch_shapes=[
                pltpu.VMEM((L, B, H), jnp.float32),   # h state, all layers
                pltpu.VMEM((L, B, H), jnp.float32),   # c state, all layers
            ],
        ),
        compiler_params=pltpu.CompilerParams(
            dimension_semantics=("arbitrary",)),      # recurrence: sequential
    )(max_len, gx0, w_ih_rest, w_hh_all, b_rest, lens2d)


# ----------------------------------------------------------------------------
# Parameter init (Keras-style, matching module.init_weights)
# ----------------------------------------------------------------------------
def xavier_uniform(key, fan_in, fan_out, shape):
    bound = jnp.sqrt(6.0 / (fan_in + fan_out))
    return jax.random.uniform(key, shape, jnp.float32, -bound, bound)


def orthogonal(key, rows, cols):
    a = jax.random.normal(key, (rows, cols), jnp.float32)
    q, r = jnp.linalg.qr(a)
    q = q * jnp.sign(jnp.diag(r))[None, :]
    return q  # (rows, cols), orthonormal columns


def init_lstm_params(key, input_size, hidden_size, num_layers):
    params = []
    for layer in range(num_layers):
        d_in = input_size if layer == 0 else hidden_size
        key, k1, k2 = jax.random.split(key, 3)
        # torch weight_ih_l{k}: (4H, d_in), xavier_uniform -> store transposed
        w_ih = xavier_uniform(k1, d_in, 4 * hidden_size,
                              (4 * hidden_size, d_in)).T         # (d_in, 4H)
        # torch weight_hh_l{k}: (4H, H), orthogonal -> store transposed
        w_hh = orthogonal(k2, 4 * hidden_size, hidden_size).T    # (H, 4H)
        # bias_ih + bias_hh, both zero-initialized
        b = jnp.zeros((1, 4 * hidden_size), jnp.float32)
        params.append((w_ih, w_hh, b))
    return params


def _reorder_gates(w, hidden_size):
    """Reorder gate columns [i, f, g, o] -> [i, f, o, g] (last axis)."""
    H = hidden_size
    return jnp.concatenate(
        [w[..., :2 * H], w[..., 3 * H:4 * H], w[..., 2 * H:3 * H]], axis=-1)


# ----------------------------------------------------------------------------
# Forward pass equivalent to FeatureExtractor.forward
# ----------------------------------------------------------------------------
def feature_extractor_forward(x, lengths, params):
    """x: (B, T, input_size) float32, lengths: (B,) int32.

    Returns (unpacked_out (B,T,H) f32, unpacked_out_len (B,) i32,
             mask_1 (B,T,H) uint8)."""
    B, T, D = x.shape
    L = len(params)
    H = params[0][1].shape[0]

    # Gate-column reorder to [i,f,o,g] + bf16 matmul operands.
    w_ih0, _, b0 = params[0]
    w_ih0_r = _reorder_gates(w_ih0, H).astype(jnp.bfloat16)      # (D, 4H)
    b0_r = _reorder_gates(b0, H)                                  # (1, 4H) f32

    # Layer-0 input projection hoisted out of the recurrence, time-major:
    # one (T*B, D) x (D, 4H) matmul with the bias folded in; gx0 kept bf16.
    x_tm = jnp.transpose(x, (1, 0, 2))                            # (T, B, D)
    gx0 = run_input_projection(x_tm.reshape(T * B, D), w_ih0_r, b0_r)
    gx0 = gx0.reshape(T, B, 4 * H)

    w_hh_all = jnp.stack(
        [_reorder_gates(p[1], H) for p in params]).astype(jnp.bfloat16)
    if L > 1:
        w_ih_rest = jnp.stack(
            [_reorder_gates(p[0], H) for p in params[1:]]).astype(jnp.bfloat16)
        b_rest = jnp.stack([_reorder_gates(p[2], H) for p in params[1:]])
    else:
        # dummies; never read by the kernel when num_layers == 1
        w_ih_rest = jnp.zeros((1, H, 4 * H), jnp.bfloat16)
        b_rest = jnp.zeros((1, 1, 4 * H), jnp.float32)

    lens2d = lengths.astype(jnp.int32).reshape(B, 1)
    max_len = jnp.max(lengths).astype(jnp.int32).reshape(1)

    y_tm = run_lstm_stack(max_len, gx0, w_ih_rest, w_hh_all, b_rest, lens2d,
                          num_layers=L, hidden_size=H)            # (T, B, H)
    y = jnp.transpose(y_tm, (1, 0, 2))                            # (B, T, H)
    # dropout between layers / output dropout: identity in eval mode

    # uint8 mask returned for API parity with the torch module; the actual
    # masking of y is already fused into the recurrence kernel's output store.
    t_idx = jnp.arange(T, dtype=jnp.int32)[None, :, None]         # (1, T, 1)
    mask_1 = jnp.broadcast_to(t_idx < lengths[:, None, None],
                              y.shape).astype(jnp.uint8)          # (B, T, H)
    return y, lengths, mask_1


# ----------------------------------------------------------------------------
# Pure-JAX reference (for correctness checking only; original [i,f,g,o] order)
# ----------------------------------------------------------------------------
def lstm_reference(x, lengths, params):
    B, T, _ = x.shape
    H = params[0][1].shape[0]
    seq = x
    for (w_ih, w_hh, b) in params:
        def step(carry, x_t):
            h, c = carry
            gates = x_t @ w_ih + h @ w_hh + b[0]
            i = jax.nn.sigmoid(gates[:, 0 * H:1 * H])
            f = jax.nn.sigmoid(gates[:, 1 * H:2 * H])
            g = jnp.tanh(gates[:, 2 * H:3 * H])
            o = jax.nn.sigmoid(gates[:, 3 * H:4 * H])
            c = f * c + i * g
            h = o * jnp.tanh(c)
            return (h, c), h
        init = (jnp.zeros((B, H), jnp.float32), jnp.zeros((B, H), jnp.float32))
        _, ys = jax.lax.scan(step, init, jnp.transpose(seq, (1, 0, 2)))
        seq = jnp.transpose(ys, (1, 0, 2))
    mask = jnp.arange(T)[None, :, None] < lengths[:, None, None]
    return seq * mask


# ----------------------------------------------------------------------------
if __name__ == "__main__":
    B, T = 2, 8
    input_size, hidden_size, num_layers = 4, 32, 2

    key = jax.random.PRNGKey(0)
    key, kx, kp = jax.random.split(key, 3)

    x = jax.random.normal(kx, (B, T, input_size), jnp.float32)
    lengths = jnp.array([T, T - 3], dtype=jnp.int32)
    params = init_lstm_params(kp, input_size, hidden_size, num_layers)

    fwd = jax.jit(feature_extractor_forward)
    unpacked_out, unpacked_out_len, mask_1 = fwd(x, lengths, params)
    jax.block_until_ready((unpacked_out, unpacked_out_len, mask_1))

    assert unpacked_out.shape == (B, T, hidden_size)
    assert mask_1.shape == (B, T, hidden_size) and mask_1.dtype == jnp.uint8
    assert unpacked_out_len.shape == (B,)
    # padded positions must be exactly zero
    assert float(jnp.abs(unpacked_out[1, T - 3:]).max()) == 0.0
    # numerical check vs pure-JAX f32 reference (loose tol: kernel matmul
    # operands and gx0 are bf16 per the perf review; elementwise math is f32)
    ref = lstm_reference(x, lengths, params)
    err = float(jnp.abs(unpacked_out - ref).max())
    assert err < 1e-1, f"max abs error vs reference: {err}"

    print("KERNEL_OK")
</pallas_src>

<mosaic_0001>
module attributes {stable_mosaic.version = 11 : i64} {
  func.func @proj_kernel(%arg0: i32, %arg1: memref<16x4xf32, #tpu.memory_space<vmem>>, %arg2: memref<4x128xbf16, #tpu.memory_space<vmem>>, %arg3: memref<1x128xf32, #tpu.memory_space<vmem>>, %arg4: memref<16x128xbf16, #tpu.memory_space<vmem>>) attributes {dimension_semantics = [#tpu.dimension_semantics<parallel>], iteration_bounds = array<i64: 1>, scalar_prefetch = 0 : i64, scratch_operands = 0 : i64, tpu.core_type = #tpu.core_type<tc>, window_params = [{transform_indices = @transform_0, window_bounds = array<i64: 16, 4>}, {pipeline_mode = #tpu.pipeline_mode<synchronous>, transform_indices = @transform_1, window_bounds = array<i64: 4, 128>}, {pipeline_mode = #tpu.pipeline_mode<synchronous>, transform_indices = @transform_2, window_bounds = array<i64: 1, 128>}, {transform_indices = @transform_3, window_bounds = array<i64: 16, 128>}]} {
    %c0 = arith.constant 0 : index
    %c0_0 = arith.constant 0 : index
    %0 = vector.load %arg1[%c0, %c0_0] : memref<16x4xf32, #tpu.memory_space<vmem>>, vector<16x4xf32>
    %1 = arith.truncf %0 : vector<16x4xf32> to vector<16x4xbf16>
    %c0_1 = arith.constant 0 : index
    %c0_2 = arith.constant 0 : index
    %2 = vector.load %arg2[%c0_1, %c0_2] : memref<4x128xbf16, #tpu.memory_space<vmem>>, vector<4x128xbf16>
    %cst = arith.constant dense<0.000000e+00> : vector<16x128xf32>
    %3 = tpu.matmul %1, %2, %cst {dimension_numbers = #tpu.dot_dimension_numbers<[1], [0], [0], [1], [0, 0, 1, 1], [], []>} : vector<16x4xbf16>, vector<4x128xbf16>, vector<16x128xf32> -> vector<16x128xf32>
    %c0_3 = arith.constant 0 : index
    %c0_4 = arith.constant 0 : index
    %4 = vector.load %arg3[%c0_3, %c0_4] : memref<1x128xf32, #tpu.memory_space<vmem>>, vector<1x128xf32>
    %5 = vector.broadcast %4 : vector<1x128xf32> to vector<16x128xf32>
    %6 = arith.addf %3, %5 : vector<16x128xf32>
    %7 = arith.truncf %6 : vector<16x128xf32> to vector<16x128xbf16>
    %c0_5 = arith.constant 0 : index
    %c0_6 = arith.constant 0 : index
    %8 = vector.load %arg4[%c0_5, %c0_6] : memref<16x128xbf16, #tpu.memory_space<vmem>>, vector<16x128xbf16>
    tpu.vector_store %arg4[%c0_5, %c0_6], %7 {strides = array<i32>} : memref<16x128xbf16, #tpu.memory_space<vmem>>, vector<16x128xbf16>,
    return
  }
  func.func @transform_0(%arg0: i32) -> (i32, i32) {
    %c0_i32 = arith.constant 0 : i32
    %c0_i32_0 = arith.constant 0 : i32
    return %arg0, %c0_i32 : i32, i32
  }
  func.func @transform_1(%arg0: i32) -> (i32, i32) {
    %c0_i32 = arith.constant 0 : i32
    %c0_i32_0 = arith.constant 0 : i32
    %c0_i32_1 = arith.constant 0 : i32
    return %c0_i32, %c0_i32_0 : i32, i32
  }
  func.func @transform_2(%arg0: i32) -> (i32, i32) {
    %c0_i32 = arith.constant 0 : i32
    %c0_i32_0 = arith.constant 0 : i32
    %c0_i32_1 = arith.constant 0 : i32
    return %c0_i32, %c0_i32_0 : i32, i32
  }
  func.func @transform_3(%arg0: i32) -> (i32, i32) {
    %c0_i32 = arith.constant 0 : i32
    %c0_i32_0 = arith.constant 0 : i32
    return %arg0, %c0_i32 : i32, i32
  }
}

module attributes {stable_mosaic.version = 11 : i64} {
  func.func @lstm_stack_kernel(%arg0: i32, %arg1: memref<1xi32, #tpu.memory_space<smem>>, %arg2: memref<8x2x128xbf16, #tpu.memory_space<vmem>>, %arg3: memref<1x32x128xbf16, #tpu.memory_space<vmem>>, %arg4: memref<2x32x128xbf16, #tpu.memory_space<vmem>>, %arg5: memref<1x1x128xf32, #tpu.memory_space<vmem>>, %arg6: memref<2x1xi32, #tpu.memory_space<vmem>>, %arg7: memref<8x2x32xf32, #tpu.memory_space<vmem>>, %arg8: memref<2x2x32xf32, #tpu.memory_space<vmem>>, %arg9: memref<2x2x32xf32, #tpu.memory_space<vmem>>) attributes {dimension_semantics = [#tpu.dimension_semantics<arbitrary>], iteration_bounds = array<i64: 1>, scalar_prefetch = 1 : i64, scratch_operands = 2 : i64, tpu.core_type = #tpu.core_type<tc>, window_params = [{transform_indices = @transform_0, window_bounds = array<i64: 8, 2, 128>}, {pipeline_mode = #tpu.pipeline_mode<synchronous>, transform_indices = @transform_1, window_bounds = array<i64: 1, 32, 128>}, {pipeline_mode = #tpu.pipeline_mode<synchronous>, transform_indices = @transform_2, window_bounds = array<i64: 2, 32, 128>}, {pipeline_mode = #tpu.pipeline_mode<synchronous>, transform_indices = @transform_3, window_bounds = array<i64: 1, 1, 128>}, {pipeline_mode = #tpu.pipeline_mode<synchronous>, transform_indices = @transform_4, window_bounds = array<i64: 2, 1>}, {transform_indices = @transform_5, window_bounds = array<i64: 8, 2, 32>}]} {
    %c8_i32 = arith.constant 8 : i32
    %0 = arith.muli %arg0, %c8_i32 : i32
    %c0_i32 = arith.constant 0 : i32
    %1 = arith.cmpi eq, %arg0, %c0_i32 : i32
    %2 = arith.extui %1 : i1 to i32
    %c0_i32_0 = arith.constant 0 : i32
    %3 = arith.cmpi ne, %2, %c0_i32_0 : i32
    scf.if %3 {
      %cst = arith.constant 0.000000e+00 : f32
      %11 = vector.broadcast %cst : f32 to vector<2x2x32xf32>
      %c0_3 = arith.constant 0 : index
      %c0_4 = arith.constant 0 : index
      %c0_5 = arith.constant 0 : index
      %12 = vector.load %arg8[%c0_3, %c0_4, %c0_5] : memref<2x2x32xf32, #tpu.memory_space<vmem>>, vector<2x2x32xf32>
      tpu.vector_store %arg8[%c0_3, %c0_4, %c0_5], %11 {strides = array<i32>} : memref<2x2x32xf32, #tpu.memory_space<vmem>>, vector<2x2x32xf32>,
      %cst_6 = arith.constant 0.000000e+00 : f32
      %13 = vector.broadcast %cst_6 : f32 to vector<2x2x32xf32>
      %c0_7 = arith.constant 0 : index
      %c0_8 = arith.constant 0 : index
      %c0_9 = arith.constant 0 : index
      %14 = vector.load %arg9[%c0_7, %c0_8, %c0_9] : memref<2x2x32xf32, #tpu.memory_space<vmem>>, vector<2x2x32xf32>
      tpu.vector_store %arg9[%c0_7, %c0_8, %c0_9], %13 {strides = array<i32>} : memref<2x2x32xf32, #tpu.memory_space<vmem>>, vector<2x2x32xf32>,
    } else {
    }
    %c0 = arith.constant 0 : index
    %4 = memref.load %arg1[%c0] : memref<1xi32, #tpu.memory_space<smem>>
    %5 = arith.cmpi sge, %0, %4 : i32
    %6 = arith.extui %5 : i1 to i32
    %c0_i32_1 = arith.constant 0 : i32
    %7 = arith.cmpi ne, %6, %c0_i32_1 : i32
    scf.if %7 {
      %cst = arith.constant 0.000000e+00 : f32
      %11 = vector.broadcast %cst : f32 to vector<8x2x32xf32>
      %c0_3 = arith.constant 0 : index
      %c0_4 = arith.constant 0 : index
      %c0_5 = arith.constant 0 : index
      %12 = vector.load %arg7[%c0_3, %c0_4, %c0_5] : memref<8x2x32xf32, #tpu.memory_space<vmem>>, vector<8x2x32xf32>
      tpu.vector_store %arg7[%c0_3, %c0_4, %c0_5], %11 {strides = array<i32>} : memref<8x2x32xf32, #tpu.memory_space<vmem>>, vector<8x2x32xf32>,
    } else {
    }
    %8 = arith.cmpi slt, %0, %4 : i32
    %9 = arith.extui %8 : i1 to i32
    %c0_i32_2 = arith.constant 0 : i32
    %10 = arith.cmpi ne, %9, %c0_i32_2 : i32
    scf.if %10 {
      %c0_3 = arith.constant 0 : index
      %c0_4 = arith.constant 0 : index
      %11 = vector.load %arg6[%c0_3, %c0_4] : memref<2x1xi32, #tpu.memory_space<vmem>>, vector<2x1xi32>
      %c0_5 = arith.constant 0 : index
      %c0_6 = arith.constant 0 : index
      %c0_7 = arith.constant 0 : index
      %12 = vector.load %arg4[%c0_5, %c0_6, %c0_7] : memref<2x32x128xbf16, #tpu.memory_space<vmem>>, vector<1x32x128xbf16>
      %13 = vector.shape_cast %12 : vector<1x32x128xbf16> to vector<32x128xbf16>
      %c1 = arith.constant 1 : index
      %c0_8 = arith.constant 0 : index
      %c0_9 = arith.constant 0 : index
      %14 = vector.load %arg4[%c1, %c0_8, %c0_9] : memref<2x32x128xbf16, #tpu.memory_space<vmem>>, vector<1x32x128xbf16>
      %15 = vector.shape_cast %14 : vector<1x32x128xbf16> to vector<32x128xbf16>
      %c0_10 = arith.constant 0 : index
      %c0_11 = arith.constant 0 : index
      %c0_12 = arith.constant 0 : index
      %16 = vector.load %arg3[%c0_10, %c0_11, %c0_12] : memref<1x32x128xbf16, #tpu.memory_space<vmem>>, vector<1x32x128xbf16>
      %17 = vector.shape_cast %16 : vector<1x32x128xbf16> to vector<32x128xbf16>
      %c0_13 = arith.constant 0 : index
      %c0_14 = arith.constant 0 : index
      %c0_15 = arith.constant 0 : index
      %18 = vector.load %arg5[%c0_13, %c0_14, %c0_15] : memref<1x1x128xf32, #tpu.memory_space<vmem>>, vector<1x1x128xf32>
      %19 = vector.shape_cast %18 : vector<1x1x128xf32> to vector<1x128xf32>
      %20 = vector.shape_cast %19 : vector<1x128xf32> to vector<1x128xf32>
      %21 = vector.broadcast %20 : vector<1x128xf32> to vector<2x128xf32>
      %c0_16 = arith.constant 0 : index
      %c0_17 = arith.constant 0 : index
      %c0_18 = arith.constant 0 : index
      %22 = vector.load %arg8[%c0_16, %c0_17, %c0_18] : memref<2x2x32xf32, #tpu.memory_space<vmem>>, vector<1x2x32xf32>
      %23 = vector.shape_cast %22 : vector<1x2x32xf32> to vector<2x32xf32>
      %c1_19 = arith.constant 1 : index
      %c0_20 = arith.constant 0 : index
      %c0_21 = arith.constant 0 : index
      %24 = vector.load %arg8[%c1_19, %c0_20, %c0_21] : memref<2x2x32xf32, #tpu.memory_space<vmem>>, vector<1x2x32xf32>
      %25 = vector.shape_cast %24 : vector<1x2x32xf32> to vector<2x32xf32>
      %c0_22 = arith.constant 0 : index
      %c0_23 = arith.constant 0 : index
      %c0_24 = arith.constant 0 : index
      %26 = vector.load %arg9[%c0_22, %c0_23, %c0_24] : memref<2x2x32xf32, #tpu.memory_space<vmem>>, vector<1x2x32xf32>
      %27 = vector.shape_cast %26 : vector<1x2x32xf32> to vector<2x32xf32>
      %c1_25 = arith.constant 1 : index
      %c0_26 = arith.constant 0 : index
      %c0_27 = arith.constant 0 : index
      %28 = vector.load %arg9[%c1_25, %c0_26, %c0_27] : memref<2x2x32xf32, #tpu.memory_space<vmem>>, vector<1x2x32xf32>
      %29 = vector.shape_cast %28 : vector<1x2x32xf32> to vector<2x32xf32>
      %30 = arith.truncf %23 : vector<2x32xf32> to vector<2x32xbf16>
      %cst = arith.constant dense<0.000000e+00> : vector<2x128xf32>
      %31 = tpu.matmul %30, %13, %cst {dimension_numbers = #tpu.dot_dimension_numbers<[1], [0], [0], [1], [0, 0, 1, 1], [], []>} : vector<2x32xbf16>, vector<32x128xbf16>, vector<2x128xf32> -> vector<2x128xf32>
      %32 = arith.truncf %25 : vector<2x32xf32> to vector<2x32xbf16>
      %cst_28 = arith.constant dense<0.000000e+00> : vector<2x128xf32>
      %33 = tpu.matmul %32, %15, %cst_28 {dimension_numbers = #tpu.dot_dimension_numbers<[1], [0], [0], [1], [0, 0, 1, 1], [], []>} : vector<2x32xbf16>, vector<32x128xbf16>, vector<2x128xf32> -> vector<2x128xf32>
      %c0_29 = arith.constant 0 : index
      %c0_30 = arith.constant 0 : index
      %c0_31 = arith.constant 0 : index
      %34 = vector.load %arg2[%c0_29, %c0_30, %c0_31] : memref<8x2x128xbf16, #tpu.memory_space<vmem>>, vector<1x2x128xbf16>
      %35 = vector.shape_cast %34 : vector<1x2x128xbf16> to vector<2x128xbf16>
      %36 = arith.extf %35 : vector<2x128xbf16> to vector<2x128xf32>
      %37 = arith.addf %36, %31 : vector<2x128xf32>
      %38 = vector.extract_strided_slice %37 {offsets = [0, 0], sizes = [2, 96], strides = [1, 1]} : vector<2x128xf32> to vector<2x96xf32>
      %39 = arith.negf %38 : vector<2x96xf32>
      %40 = math.exp %39 : vector<2x96xf32>
      %cst_32 = arith.constant 1.000000e+00 : f32
      %41 = vector.broadcast %cst_32 : f32 to vector<2x96xf32>
      %42 = arith.addf %41, %40 : vector<2x96xf32>
      %43 = arith.divf %41, %42 : vector<2x96xf32>
      %44 = vector.extract_strided_slice %37 {offsets = [0, 96], sizes = [2, 32], strides = [1, 1]} : vector<2x128xf32> to vector<2x32xf32>
      %45 = math.tanh %44 : vector<2x32xf32>
      %46 = vector.extract_strided_slice %43 {offsets = [0, 32], sizes = [2, 32], strides = [1, 1]} : vector<2x96xf32> to vector<2x32xf32>
      %47 = arith.mulf %46, %27 : vector<2x32xf32>
      %48 = vector.extract_strided_slice %43 {offsets = [0, 0], sizes = [2, 32], strides = [1, 1]} : vector<2x96xf32> to vector<2x32xf32>
      %49 = arith.mulf %48, %45 : vector<2x32xf32>
      %50 = arith.addf %47, %49 : vector<2x32xf32>
      %51 = vector.extract_strided_slice %43 {offsets = [0, 64], sizes = [2, 32], strides = [1, 1]} : vector<2x96xf32> to vector<2x32xf32>
      %52 = math.tanh %50 : vector<2x32xf32>
      %53 = arith.mulf %51, %52 : vector<2x32xf32>
      %54 = arith.truncf %53 : vector<2x32xf32> to vector<2x32xbf16>
      %cst_33 = arith.constant dense<0.000000e+00> : vector<2x128xf32>
      %55 = tpu.matmul %54, %17, %cst_33 {dimension_numbers = #tpu.dot_dimension_numbers<[1], [0], [0], [1], [0, 0, 1, 1], [], []>} : vector<2x32xbf16>, vector<32x128xbf16>, vector<2x128xf32> -> vector<2x128xf32>
      %56 = arith.addf %55, %33 : vector<2x128xf32>
      %57 = arith.addf %56, %21 : vector<2x128xf32>
      %58 = vector.extract_strided_slice %57 {offsets = [0, 0], sizes = [2, 96], strides = [1, 1]} : vector<2x128xf32> to vector<2x96xf32>
      %59 = arith.negf %58 : vector<2x96xf32>
      %60 = math.exp %59 : vector<2x96xf32>
      %cst_34 = arith.constant 1.000000e+00 : f32
      %61 = vector.broadcast %cst_34 : f32 to vector<2x96xf32>
      %62 = arith.addf %61, %60 : vector<2x96xf32>
      %63 = arith.divf %61, %62 : vector<2x96xf32>
      %64 = vector.extract_strided_slice %57 {offsets = [0, 96], sizes = [2, 32], strides = [1, 1]} : vector<2x128xf32> to vector<2x32xf32>
      %65 = math.tanh %64 : vector<2x32xf32>
      %66 = vector.extract_strided_slice %63 {offsets = [0, 32], sizes = [2, 32], strides = [1, 1]} : vector<2x96xf32> to vector<2x32xf32>
      %67 = arith.mulf %66, %29 : vector<2x32xf32>
      %68 = vector.extract_strided_slice %63 {offsets = [0, 0], sizes = [2, 32], strides = [1, 1]} : vector<2x96xf32> to vector<2x32xf32>
      %69 = arith.mulf %68, %65 : vector<2x32xf32>
      %70 = arith.addf %67, %69 : vector<2x32xf32>
      %71 = vector.extract_strided_slice %63 {offsets = [0, 64], sizes = [2, 32], strides = [1, 1]} : vector<2x96xf32> to vector<2x32xf32>
      %72 = math.tanh %70 : vector<2x32xf32>
      %73 = arith.mulf %71, %72 : vector<2x32xf32>
      %c0_i32_35 = arith.constant 0 : i32
      %74 = arith.addi %0, %c0_i32_35 : i32
      %75 = vector.broadcast %74 : i32 to vector<2x1xi32>
      %76 = arith.cmpi slt, %75, %11 : vector<2x1xi32>
      %cst_36 = arith.constant 0.000000e+00 : f32
      %77 = vector.shape_cast %76 : vector<2x1xi1> to vector<2x1xi1>
      %78 = vector.broadcast %77 : vector<2x1xi1> to vector<2x32xi1>
      %79 = vector.broadcast %cst_36 : f32 to vector<2x32xf32>
      %80 = arith.select %78, %73, %79 : vector<2x32xi1>, vector<2x32xf32>
      %c0_37 = arith.constant 0 : index
      %c0_38 = arith.constant 0 : index
      %c0_39 = arith.constant 0 : index
      %81 = vector.load %arg7[%c0_37, %c0_38, %c0_39] : memref<8x2x32xf32, #tpu.memory_space<vmem>>, vector<1x2x32xf32>
      %82 = vector.shape_cast %81 : vector<1x2x32xf32> to vector<2x32xf32>
      %83 = vector.shape_cast %80 : vector<2x32xf32> to vector<1x2x32xf32>
      tpu.vector_store %arg7[%c0_37, %c0_38, %c0_39], %83 {strides = array<i32>} : memref<8x2x32xf32, #tpu.memory_space<vmem>>, vector<1x2x32xf32>,
      %84 = arith.truncf %53 : vector<2x32xf32> to vector<2x32xbf16>
      %cst_40 = arith.constant dense<0.000000e+00> : vector<2x128xf32>
      %85 = tpu.matmul %84, %13, %cst_40 {dimension_numbers = #tpu.dot_dimension_numbers<[1], [0], [0], [1], [0, 0, 1, 1], [], []>} : vector<2x32xbf16>, vector<32x128xbf16>, vector<2x128xf32> -> vector<2x128xf32>
      %86 = arith.truncf %73 : vector<2x32xf32> to vector<2x32xbf16>
      %cst_41 = arith.constant dense<0.000000e+00> : vector<2x128xf32>
      %87 = tpu.matmul %86, %15, %cst_41 {dimension_numbers = #tpu.dot_dimension_numbers<[1], [0], [0], [1], [0, 0, 1, 1], [], []>} : vector<2x32xbf16>, vector<32x128xbf16>, vector<2x128xf32> -> vector<2x128xf32>
      %c1_42 = arith.constant 1 : index
      %c0_43 = arith.constant 0 : index
      %c0_44 = arith.constant 0 : index
      %88 = vector.load %arg2[%c1_42, %c0_43, %c0_44] : memref<8x2x128xbf16, #tpu.memory_space<vmem>>, vector<1x2x128xbf16>
      %89 = vector.shape_cast %88 : vector<1x2x128xbf16> to vector<2x128xbf16>
      %90 = arith.extf %89 : vector<2x128xbf16> to vector<2x128xf32>
      %91 = arith.addf %90, %85 : vector<2x128xf32>
      %92 = vector.extract_strided_slice %91 {offsets = [0, 0], sizes = [2, 96], strides = [1, 1]} : vector<2x128xf32> to vector<2x96xf32>
      %93 = arith.negf %92 : vector<2x96xf32>
      %94 = math.exp %93 : vector<2x96xf32>
      %cst_45 = arith.constant 1.000000e+00 : f32
      %95 = vector.broadcast %cst_45 : f32 to vector<2x96xf32>
      %96 = arith.addf %95, %94 : vector<2x96xf32>
      %97 = arith.divf %95, %96 : vector<2x96xf32>
      %98 = vector.extract_strided_slice %91 {offsets = [0, 96], sizes = [2, 32], strides = [1, 1]} : vector<2x128xf32> to vector<2x32xf32>
      %99 = math.tanh %98 : vector<2x32xf32>
      %100 = vector.extract_strided_slice %97 {offsets = [0, 32], sizes = [2, 32], strides = [1, 1]} : vector<2x96xf32> to vector<2x32xf32>
      %101 = arith.mulf %100, %50 : vector<2x32xf32>
      %102 = vector.extract_strided_slice %97 {offsets = [0, 0], sizes = [2, 32], strides = [1, 1]} : vector<2x96xf32> to vector<2x32xf32>
      %103 = arith.mulf %102, %99 : vector<2x32xf32>
      %104 = arith.addf %101, %103 : vector<2x32xf32>
      %105 = vector.extract_strided_slice %97 {offsets = [0, 64], sizes = [2, 32], strides = [1, 1]} : vector<2x96xf32> to vector<2x32xf32>
      %106 = math.tanh %104 : vector<2x32xf32>
      %107 = arith.mulf %105, %106 : vector<2x32xf32>
      %108 = arith.truncf %107 : vector<2x32xf32> to vector<2x32xbf16>
      %cst_46 = arith.constant dense<0.000000e+00> : vector<2x128xf32>
      %109 = tpu.matmul %108, %17, %cst_46 {dimension_numbers = #tpu.dot_dimension_numbers<[1], [0], [0], [1], [0, 0, 1, 1], [], []>} : vector<2x32xbf16>, vector<32x128xbf16>, vector<2x128xf32> -> vector<2x128xf32>
      %110 = arith.addf %109, %87 : vector<2x128xf32>
      %111 = arith.addf %110, %21 : vector<2x128xf32>
      %112 = vector.extract_strided_slice %111 {offsets = [0, 0], sizes = [2, 96], strides = [1, 1]} : vector<2x128xf32> to vector<2x96xf32>
      %113 = arith.negf %112 : vector<2x96xf32>
      %114 = math.exp %113 : vector<2x96xf32>
      %cst_47 = arith.constant 1.000000e+00 : f32
      %115 = vector.broadcast %cst_47 : f32 to vector<2x96xf32>
      %116 = arith.addf %115, %114 : vector<2x96xf32>
      %117 = arith.divf %115, %116 : vector<2x96xf32>
      %118 = vector.extract_strided_slice %111 {offsets = [0, 96], sizes = [2, 32], strides = [1, 1]} : vector<2x128xf32> to vector<2x32xf32>
      %119 = math.tanh %118 : vector<2x32xf32>
      %120 = vector.extract_strided_slice %117 {offsets = [0, 32], sizes = [2, 32], strides = [1, 1]} : vector<2x96xf32> to vector<2x32xf32>
      %121 = arith.mulf %120, %70 : vector<2x32xf32>
      %122 = vector.extract_strided_slice %117 {offsets = [0, 0], sizes = [2, 32], strides = [1, 1]} : vector<2x96xf32> to vector<2x32xf32>
      %123 = arith.mulf %122, %119 : vector<2x32xf32>
      %124 = arith.addf %121, %123 : vector<2x32xf32>
      %125 = vector.extract_strided_slice %117 {offsets = [0, 64], sizes = [2, 32], strides = [1, 1]} : vector<2x96xf32> to vector<2x32xf32>
      %126 = math.tanh %124 : vector<2x32xf32>
      %127 = arith.mulf %125, %126 : vector<2x32xf32>
      %c1_i32 = arith.constant 1 : i32
      %128 = arith.addi %0, %c1_i32 : i32
      %129 = vector.broadcast %128 : i32 to vector<2x1xi32>
      %130 = arith.cmpi slt, %129, %11 : vector<2x1xi32>
      %cst_48 = arith.constant 0.000000e+00 : f32
      %131 = vector.shape_cast %130 : vector<2x1xi1> to vector<2x1xi1>
      %132 = vector.broadcast %131 : vector<2x1xi1> to vector<2x32xi1>
      %133 = vector.broadcast %cst_48 : f32 to vector<2x32xf32>
      %134 = arith.select %132, %127, %133 : vector<2x32xi1>, vector<2x32xf32>
      %c1_49 = arith.constant 1 : index
      %c0_50 = arith.constant 0 : index
      %c0_51 = arith.constant 0 : index
      %135 = vector.load %arg7[%c1_49, %c0_50, %c0_51] : memref<8x2x32xf32, #tpu.memory_space<vmem>>, vector<1x2x32xf32>
      %136 = vector.shape_cast %135 : vector<1x2x32xf32> to vector<2x32xf32>
      %137 = vector.shape_cast %134 : vector<2x32xf32> to vector<1x2x32xf32>
      tpu.vector_store %arg7[%c1_49, %c0_50, %c0_51], %137 {strides = array<i32>} : memref<8x2x32xf32, #tpu.memory_space<vmem>>, vector<1x2x32xf32>,
      %138 = arith.truncf %107 : vector<2x32xf32> to vector<2x32xbf16>
      %cst_52 = arith.constant dense<0.000000e+00> : vector<2x128xf32>
      %139 = tpu.matmul %138, %13, %cst_52 {dimension_numbers = #tpu.dot_dimension_numbers<[1], [0], [0], [1], [0, 0, 1, 1], [], []>} : vector<2x32xbf16>, vector<32x128xbf16>, vector<2x128xf32> -> vector<2x128xf32>
      %140 = arith.truncf %127 : vector<2x32xf32> to vector<2x32xbf16>
      %cst_53 = arith.constant dense<0.000000e+00> : vector<2x128xf32>
      %141 = tpu.matmul %140, %15, %cst_53 {dimension_numbers = #tpu.dot_dimension_numbers<[1], [0], [0], [1], [0, 0, 1, 1], [], []>} : vector<2x32xbf16>, vector<32x128xbf16>, vector<2x128xf32> -> vector<2x128xf32>
      %c2 = arith.constant 2 : index
      %c0_54 = arith.constant 0 : index
      %c0_55 = arith.constant 0 : index
      %142 = vector.load %arg2[%c2, %c0_54, %c0_55] : memref<8x2x128xbf16, #tpu.memory_space<vmem>>, vector<1x2x128xbf16>
      %143 = vector.shape_cast %142 : vector<1x2x128xbf16> to vector<2x128xbf16>
      %144 = arith.extf %143 : vector<2x128xbf16> to vector<2x128xf32>
      %145 = arith.addf %144, %139 : vector<2x128xf32>
      %146 = vector.extract_strided_slice %145 {offsets = [0, 0], sizes = [2, 96], strides = [1, 1]} : vector<2x128xf32> to vector<2x96xf32>
      %147 = arith.negf %146 : vector<2x96xf32>
      %148 = math.exp %147 : vector<2x96xf32>
      %cst_56 = arith.constant 1.000000e+00 : f32
      %149 = vector.broadcast %cst_56 : f32 to vector<2x96xf32>
      %150 = arith.addf %149, %148 : vector<2x96xf32>
      %151 = arith.divf %149, %150 : vector<2x96xf32>
      %152 = vector.extract_strided_slice %145 {offsets = [0, 96], sizes = [2, 32], strides = [1, 1]} : vector<2x128xf32> to vector<2x32xf32>
      %153 = math.tanh %152 : vector<2x32xf32>
      %154 = vector.extract_strided_slice %151 {offsets = [0, 32], sizes = [2, 32], strides = [1, 1]} : vector<2x96xf32> to vector<2x32xf32>
      %155 = arith.mulf %154, %104 : vector<2x32xf32>
      %156 = vector.extract_strided_slice %151 {offsets = [0, 0], sizes = [2, 32], strides = [1, 1]} : vector<2x96xf32> to vector<2x32xf32>
      %157 = arith.mulf %156, %153 : vector<2x32xf32>
      %158 = arith.addf %155, %157 : vector<2x32xf32>
      %159 = vector.extract_strided_slice %151 {offsets = [0, 64], sizes = [2, 32], strides = [1, 1]} : vector<2x96xf32> to vector<2x32xf32>
      %160 = math.tanh %158 : vector<2x32xf32>
      %161 = arith.mulf %159, %160 : vector<2x32xf32>
      %162 = arith.truncf %161 : vector<2x32xf32> to vector<2x32xbf16>
      %cst_57 = arith.constant dense<0.000000e+00> : vector<2x128xf32>
      %163 = tpu.matmul %162, %17, %cst_57 {dimension_numbers = #tpu.dot_dimension_numbers<[1], [0], [0], [1], [0, 0, 1, 1], [], []>} : vector<2x32xbf16>, vector<32x128xbf16>, vector<2x128xf32> -> vector<2x128xf32>
      %164 = arith.addf %163, %141 : vector<2x128xf32>
      %165 = arith.addf %164, %21 : vector<2x128xf32>
      %166 = vector.extract_strided_slice %165 {offsets = [0, 0], sizes = [2, 96], strides = [1, 1]} : vector<2x128xf32> to vector<2x96xf32>
      %167 = arith.negf %166 : vector<2x96xf32>
      %168 = math.exp %167 : vector<2x96xf32>
      %cst_58 = arith.constant 1.000000e+00 : f32
      %169 = vector.broadcast %cst_58 : f32 to vector<2x96xf32>
      %170 = arith.addf %169, %168 : vector<2x96xf32>
      %171 = arith.divf %169, %170 : vector<2x96xf32>
      %172 = vector.extract_strided_slice %165 {offsets = [0, 96], sizes = [2, 32], strides = [1, 1]} : vector<2x128xf32> to vector<2x32xf32>
      %173 = math.tanh %172 : vector<2x32xf32>
      %174 = vector.extract_strided_slice %171 {offsets = [0, 32], sizes = [2, 32], strides = [1, 1]} : vector<2x96xf32> to vector<2x32xf32>
      %175 = arith.mulf %174, %124 : vector<2x32xf32>
      %176 = vector.extract_strided_slice %171 {offsets = [0, 0], sizes = [2, 32], strides = [1, 1]} : vector<2x96xf32> to vector<2x32xf32>
      %177 = arith.mulf %176, %173 : vector<2x32xf32>
      %178 = arith.addf %175, %177 : vector<2x32xf32>
      %179 = vector.extract_strided_slice %171 {offsets = [0, 64], sizes = [2, 32], strides = [1, 1]} : vector<2x96xf32> to vector<2x32xf32>
      %180 = math.tanh %178 : vector<2x32xf32>
      %181 = arith.mulf %179, %180 : vector<2x32xf32>
      %c2_i32 = arith.constant 2 : i32
      %182 = arith.addi %0, %c2_i32 : i32
      %183 = vector.broadcast %182 : i32 to vector<2x1xi32>
      %184 = arith.cmpi slt, %183, %11 : vector<2x1xi32>
      %cst_59 = arith.constant 0.000000e+00 : f32
      %185 = vector.shape_cast %184 : vector<2x1xi1> to vector<2x1xi1>
      %186 = vector.broadcast %185 : vector<2x1xi1> to vector<2x32xi1>
      %187 = vector.broadcast %cst_59 : f32 to vector<2x32xf32>
      %188 = arith.select %186, %181, %187 : vector<2x32xi1>, vector<2x32xf32>
      %c2_60 = arith.constant 2 : index
      %c0_61 = arith.constant 0 : index
      %c0_62 = arith.constant 0 : index
      %189 = vector.load %arg7[%c2_60, %c0_61, %c0_62] : memref<8x2x32xf32, #tpu.memory_space<vmem>>, vector<1x2x32xf32>
      %190 = vector.shape_cast %189 : vector<1x2x32xf32> to vector<2x32xf32>
      %191 = vector.shape_cast %188 : vector<2x32xf32> to vector<1x2x32xf32>
      tpu.vector_store %arg7[%c2_60, %c0_61, %c0_62], %191 {strides = array<i32>} : memref<8x2x32xf32, #tpu.memory_space<vmem>>, vector<1x2x32xf32>,
      %192 = arith.truncf %161 : vector<2x32xf32> to vector<2x32xbf16>
      %cst_63 = arith.constant dense<0.000000e+00> : vector<2x128xf32>
      %193 = tpu.matmul %192, %13, %cst_63 {dimension_numbers = #tpu.dot_dimension_numbers<[1], [0], [0], [1], [0, 0, 1, 1], [], []>} : vector<2x32xbf16>, vector<32x128xbf16>, vector<2x128xf32> -> vector<2x128xf32>
      %194 = arith.truncf %181 : vector<2x32xf32> to vector<2x32xbf16>
      %cst_64 = arith.constant dense<0.000000e+00> : vector<2x128xf32>
      %195 = tpu.matmul %194, %15, %cst_64 {dimension_numbers = #tpu.dot_dimension_numbers<[1], [0], [0], [1], [0, 0, 1, 1], [], []>} : vector<2x32xbf16>, vector<32x128xbf16>, vector<2x128xf32> -> vector<2x128xf32>
      %c3 = arith.constant 3 : index
      %c0_65 = arith.constant 0 : index
      %c0_66 = arith.constant 0 : index
      %196 = vector.load %arg2[%c3, %c0_65, %c0_66] : memref<8x2x128xbf16, #tpu.memory_space<vmem>>, vector<1x2x128xbf16>
      %197 = vector.shape_cast %196 : vector<1x2x128xbf16> to vector<2x128xbf16>
      %198 = arith.extf %197 : vector<2x128xbf16> to vector<2x128xf32>
      %199 = arith.addf %198, %193 : vector<2x128xf32>
      %200 = vector.extract_strided_slice %199 {offsets = [0, 0], sizes = [2, 96], strides = [1, 1]} : vector<2x128xf32> to vector<2x96xf32>
      %201 = arith.negf %200 : vector<2x96xf32>
      %202 = math.exp %201 : vector<2x96xf32>
      %cst_67 = arith.constant 1.000000e+00 : f32
      %203 = vector.broadcast %cst_67 : f32 to vector<2x96xf32>
      %204 = arith.addf %203, %202 : vector<2x96xf32>
      %205 = arith.divf %203, %204 : vector<2x96xf32>
      %206 = vector.extract_strided_slice %199 {offsets = [0, 96], sizes = [2, 32], strides = [1, 1]} : vector<2x128xf32> to vector<2x32xf32>
      %207 = math.tanh %206 : vector<2x32xf32>
      %208 = vector.extract_strided_slice %205 {offsets = [0, 32], sizes = [2, 32], strides = [1, 1]} : vector<2x96xf32> to vector<2x32xf32>
      %209 = arith.mulf %208, %158 : vector<2x32xf32>
      %210 = vector.extract_strided_slice %205 {offsets = [0, 0], sizes = [2, 32], strides = [1, 1]} : vector<2x96xf32> to vector<2x32xf32>
      %211 = arith.mulf %210, %207 : vector<2x32xf32>
      %212 = arith.addf %209, %211 : vector<2x32xf32>
      %213 = vector.extract_strided_slice %205 {offsets = [0, 64], sizes = [2, 32], strides = [1, 1]} : vector<2x96xf32> to vector<2x32xf32>
      %214 = math.tanh %212 : vector<2x32xf32>
      %215 = arith.mulf %213, %214 : vector<2x32xf32>
      %216 = arith.truncf %215 : vector<2x32xf32> to vector<2x32xbf16>
      %cst_68 = arith.constant dense<0.000000e+00> : vector<2x128xf32>
      %217 = tpu.matmul %216, %17, %cst_68 {dimension_numbers = #tpu.dot_dimension_numbers<[1], [0], [0], [1], [0, 0, 1, 1], [], []>} : vector<2x32xbf16>, vector<32x128xbf16>, vector<2x128xf32> -> vector<2x128xf32>
      %218 = arith.addf %217, %195 : vector<2x128xf32>
      %219 = arith.addf %218, %21 : vector<2x128xf32>
      %220 = vector.extract_strided_slice %219 {offsets = [0, 0], sizes = [2, 96], strides = [1, 1]} : vector<2x128xf32> to vector<2x96xf32>
      %221 = arith.negf %220 : vector<2x96xf32>
      %222 = math.exp %221 : vector<2x96xf32>
      %cst_69 = arith.constant 1.000000e+00 : f32
      %223 = vector.broadcast %cst_69 : f32 to vector<2x96xf32>
      %224 = arith.addf %223, %222 : vector<2x96xf32>
      %225 = arith.divf %223, %224 : vector<2x96xf32>
      %226 = vector.extract_strided_slice %219 {offsets = [0, 96], sizes = [2, 32], strides = [1, 1]} : vector<2x128xf32> to vector<2x32xf32>
      %227 = math.tanh %226 : vector<2x32xf32>
      %228 = vector.extract_strided_slice %225 {offsets = [0, 32], sizes = [2, 32], strides = [1, 1]} : vector<2x96xf32> to vector<2x32xf32>
      %229 = arith.mulf %228, %178 : vector<2x32xf32>
      %230 = vector.extract_strided_slice %225 {offsets = [0, 0], sizes = [2, 32], strides = [1, 1]} : vector<2x96xf32> to vector<2x32xf32>
      %231 = arith.mulf %230, %227 : vector<2x32xf32>
      %232 = arith.addf %229, %231 : vector<2x32xf32>
      %233 = vector.extract_strided_slice %225 {offsets = [0, 64], sizes = [2, 32], strides = [1, 1]} : vector<2x96xf32> to vector<2x32xf32>
      %234 = math.tanh %232 : vector<2x32xf32>
      %235 = arith.mulf %233, %234 : vector<2x32xf32>
      %c3_i32 = arith.constant 3 : i32
      %236 = arith.addi %0, %c3_i32 : i32
      %237 = vector.broadcast %236 : i32 to vector<2x1xi32>
      %238 = arith.cmpi slt, %237, %11 : vector<2x1xi32>
      %cst_70 = arith.constant 0.000000e+00 : f32
      %239 = vector.shape_cast %238 : vector<2x1xi1> to vector<2x1xi1>
      %240 = vector.broadcast %239 : vector<2x1xi1> to vector<2x32xi1>
      %241 = vector.broadcast %cst_70 : f32 to vector<2x32xf32>
      %242 = arith.select %240, %235, %241 : vector<2x32xi1>, vector<2x32xf32>
      %c3_71 = arith.constant 3 : index
      %c0_72 = arith.constant 0 : index
      %c0_73 = arith.constant 0 : index
      %243 = vector.load %arg7[%c3_71, %c0_72, %c0_73] : memref<8x2x32xf32, #tpu.memory_space<vmem>>, vector<1x2x32xf32>
      %244 = vector.shape_cast %243 : vector<1x2x32xf32> to vector<2x32xf32>
      %245 = vector.shape_cast %242 : vector<2x32xf32> to vector<1x2x32xf32>
      tpu.vector_store %arg7[%c3_71, %c0_72, %c0_73], %245 {strides = array<i32>} : memref<8x2x32xf32, #tpu.memory_space<vmem>>, vector<1x2x32xf32>,
      %246 = arith.truncf %215 : vector<2x32xf32> to vector<2x32xbf16>
      %cst_74 = arith.constant dense<0.000000e+00> : vector<2x128xf32>
      %247 = tpu.matmul %246, %13, %cst_74 {dimension_numbers = #tpu.dot_dimension_numbers<[1], [0], [0], [1], [0, 0, 1, 1], [], []>} : vector<2x32xbf16>, vector<32x128xbf16>, vector<2x128xf32> -> vector<2x128xf32>
      %248 = arith.truncf %235 : vector<2x32xf32> to vector<2x32xbf16>
      %cst_75 = arith.constant dense<0.000000e+00> : vector<2x128xf32>
      %249 = tpu.matmul %248, %15, %cst_75 {dimension_numbers = #tpu.dot_dimension_numbers<[1], [0], [0], [1], [0, 0, 1, 1], [], []>} : vector<2x32xbf16>, vector<32x128xbf16>, vector<2x128xf32> -> vector<2x128xf32>
      %c4 = arith.constant 4 : index
      %c0_76 = arith.constant 0 : index
      %c0_77 = arith.constant 0 : index
      %250 = vector.load %arg2[%c4, %c0_76, %c0_77] : memref<8x2x128xbf16, #tpu.memory_space<vmem>>, vector<1x2x128xbf16>
      %251 = vector.shape_cast %250 : vector<1x2x128xbf16> to vector<2x128xbf16>
      %252 = arith.extf %251 : vector<2x128xbf16> to vector<2x128xf32>
      %253 = arith.addf %252, %247 : vector<2x128xf32>
      %254 = vector.extract_strided_slice %253 {offsets = [0, 0], sizes = [2, 96], strides = [1, 1]} : vector<2x128xf32> to vector<2x96xf32>
      %255 = arith.negf %254 : vector<2x96xf32>
      %256 = math.exp %255 : vector<2x96xf32>
      %cst_78 = arith.constant 1.000000e+00 : f32
      %257 = vector.broadcast %cst_78 : f32 to vector<2x96xf32>
      %258 = arith.addf %257, %256 : vector<2x96xf32>
      %259 = arith.divf %257, %258 : vector<2x96xf32>
      %260 = vector.extract_strided_slice %253 {offsets = [0, 96], sizes = [2, 32], strides = [1, 1]} : vector<2x128xf32> to vector<2x32xf32>
      %261 = math.tanh %260 : vector<2x32xf32>
      %262 = vector.extract_strided_slice %259 {offsets = [0, 32], sizes = [2, 32], strides = [1, 1]} : vector<2x96xf32> to vector<2x32xf32>
      %263 = arith.mulf %262, %212 : vector<2x32xf32>
      %264 = vector.extract_strided_slice %259 {offsets = [0, 0], sizes = [2, 32], strides = [1, 1]} : vector<2x96xf32> to vector<2x32xf32>
      %265 = arith.mulf %264, %261 : vector<2x32xf32>
      %266 = arith.addf %263, %265 : vector<2x32xf32>
      %267 = vector.extract_strided_slice %259 {offsets = [0, 64], sizes = [2, 32], strides = [1, 1]} : vector<2x96xf32> to vector<2x32xf32>
      %268 = math.tanh %266 : vector<2x32xf32>
      %269 = arith.mulf %267, %268 : vector<2x32xf32>
      %270 = arith.truncf %269 : vector<2x32xf32> to vector<2x32xbf16>
      %cst_79 = arith.constant dense<0.000000e+00> : vector<2x128xf32>
      %271 = tpu.matmul %270, %17, %cst_79 {dimension_numbers = #tpu.dot_dimension_numbers<[1], [0], [0], [1], [0, 0, 1, 1], [], []>} : vector<2x32xbf16>, vector<32x128xbf16>, vector<2x128xf32> -> vector<2x128xf32>
      %272 = arith.addf %271, %249 : vector<2x128xf32>
      %273 = arith.addf %272, %21 : vector<2x128xf32>
      %274 = vector.extract_strided_slice %273 {offsets = [0, 0], sizes = [2, 96], strides = [1, 1]} : vector<2x128xf32> to vector<2x96xf32>
      %275 = arith.negf %274 : vector<2x96xf32>
      %276 = math.exp %275 : vector<2x96xf32>
      %cst_80 = arith.constant 1.000000e+00 : f32
      %277 = vector.broadcast %cst_80 : f32 to vector<2x96xf32>
      %278 = arith.addf %277, %276 : vector<2x96xf32>
      %279 = arith.divf %277, %278 : vector<2x96xf32>
      %280 = vector.extract_strided_slice %273 {offsets = [0, 96], sizes = [2, 32], strides = [1, 1]} : vector<2x128xf32> to vector<2x32xf32>
      %281 = math.tanh %280 : vector<2x32xf32>
      %282 = vector.extract_strided_slice %279 {offsets = [0, 32], sizes = [2, 32], strides = [1, 1]} : vector<2x96xf32> to vector<2x32xf32>
      %283 = arith.mulf %282, %232 : vector<2x32xf32>
      %284 = vector.extract_strided_slice %279 {offsets = [0, 0], sizes = [2, 32], strides = [1, 1]} : vector<2x96xf32> to vector<2x32xf32>
      %285 = arith.mulf %284, %281 : vector<2x32xf32>
      %286 = arith.addf %283, %285 : vector<2x32xf32>
      %287 = vector.extract_strided_slice %279 {offsets = [0, 64], sizes = [2, 32], strides = [1, 1]} : vector<2x96xf32> to vector<2x32xf32>
      %288 = math.tanh %286 : vector<2x32xf32>
      %289 = arith.mulf %287, %288 : vector<2x32xf32>
      %c4_i32 = arith.constant 4 : i32
      %290 = arith.addi %0, %c4_i32 : i32
      %291 = vector.broadcast %290 : i32 to vector<2x1xi32>
      %292 = arith.cmpi slt, %291, %11 : vector<2x1xi32>
      %cst_81 = arith.constant 0.000000e+00 : f32
      %293 = vector.shape_cast %292 : vector<2x1xi1> to vector<2x1xi1>
      %294 = vector.broadcast %293 : vector<2x1xi1> to vector<2x32xi1>
      %295 = vector.broadcast %cst_81 : f32 to vector<2x32xf32>
      %296 = arith.select %294, %289, %295 : vector<2x32xi1>, vector<2x32xf32>
      %c4_82 = arith.constant 4 : index
      %c0_83 = arith.constant 0 : index
      %c0_84 = arith.constant 0 : index
      %297 = vector.load %arg7[%c4_82, %c0_83, %c0_84] : memref<8x2x32xf32, #tpu.memory_space<vmem>>, vector<1x2x32xf32>
      %298 = vector.shape_cast %297 : vector<1x2x32xf32> to vector<2x32xf32>
      %299 = vector.shape_cast %296 : vector<2x32xf32> to vector<1x2x32xf32>
      tpu.vector_store %arg7[%c4_82, %c0_83, %c0_84], %299 {strides = array<i32>} : memref<8x2x32xf32, #tpu.memory_space<vmem>>, vector<1x2x32xf32>,
      %300 = arith.truncf %269 : vector<2x32xf32> to vector<2x32xbf16>
      %cst_85 = arith.constant dense<0.000000e+00> : vector<2x128xf32>
      %301 = tpu.matmul %300, %13, %cst_85 {dimension_numbers = #tpu.dot_dimension_numbers<[1], [0], [0], [1], [0, 0, 1, 1], [], []>} : vector<2x32xbf16>, vector<32x128xbf16>, vector<2x128xf32> -> vector<2x128xf32>
      %302 = arith.truncf %289 : vector<2x32xf32> to vector<2x32xbf16>
      %cst_86 = arith.constant dense<0.000000e+00> : vector<2x128xf32>
      %303 = tpu.matmul %302, %15, %cst_86 {dimension_numbers = #tpu.dot_dimension_numbers<[1], [0], [0], [1], [0, 0, 1, 1], [], []>} : vector<2x32xbf16>, vector<32x128xbf16>, vector<2x128xf32> -> vector<2x128xf32>
      %c5 = arith.constant 5 : index
      %c0_87 = arith.constant 0 : index
      %c0_88 = arith.constant 0 : index
      %304 = vector.load %arg2[%c5, %c0_87, %c0_88] : memref<8x2x128xbf16, #tpu.memory_space<vmem>>, vector<1x2x128xbf16>
      %305 = vector.shape_cast %304 : vector<1x2x128xbf16> to vector<2x128xbf16>
      %306 = arith.extf %305 : vector<2x128xbf16> to vector<2x128xf32>
      %307 = arith.addf %306, %301 : vector<2x128xf32>
      %308 = vector.extract_strided_slice %307 {offsets = [0, 0], sizes = [2, 96], strides = [1, 1]} : vector<2x128xf32> to vector<2x96xf32>
      %309 = arith.negf %308 : vector<2x96xf32>
      %310 = math.exp %309 : vector<2x96xf32>
      %cst_89 = arith.constant 1.000000e+00 : f32
      %311 = vector.broadcast %cst_89 : f32 to vector<2x96xf32>
      %312 = arith.addf %311, %310 : vector<2x96xf32>
      %313 = arith.divf %311, %312 : vector<2x96xf32>
      %314 = vector.extract_strided_slice %307 {offsets = [0, 96], sizes = [2, 32], strides = [1, 1]} : vector<2x128xf32> to vector<2x32xf32>
      %315 = math.tanh %314 : vector<2x32xf32>
      %316 = vector.extract_strided_slice %313 {offsets = [0, 32], sizes = [2, 32], strides = [1, 1]} : vector<2x96xf32> to vector<2x32xf32>
      %317 = arith.mulf %316, %266 : vector<2x32xf32>
      %318 = vector.extract_strided_slice %313 {offsets = [0, 0], sizes = [2, 32], strides = [1, 1]} : vector<2x96xf32> to vector<2x32xf32>
      %319 = arith.mulf %318, %315 : vector<2x32xf32>
      %320 = arith.addf %317, %319 : vector<2x32xf32>
      %321 = vector.extract_strided_slice %313 {offsets = [0, 64], sizes = [2, 32], strides = [1, 1]} : vector<2x96xf32> to vector<2x32xf32>
      %322 = math.tanh %320 : vector<2x32xf32>
      %323 = arith.mulf %321, %322 : vector<2x32xf32>
      %324 = arith.truncf %323 : vector<2x32xf32> to vector<2x32xbf16>
      %cst_90 = arith.constant dense<0.000000e+00> : vector<2x128xf32>
      %325 = tpu.matmul %324, %17, %cst_90 {dimension_numbers = #tpu.dot_dimension_numbers<[1], [0], [0], [1], [0, 0, 1, 1], [], []>} : vector<2x32xbf16>, vector<32x128xbf16>, vector<2x128xf32> -> vector<2x128xf32>
      %326 = arith.addf %325, %303 : vector<2x128xf32>
      %327 = arith.addf %326, %21 : vector<2x128xf32>
      %328 = vector.extract_strided_slice %327 {offsets = [0, 0], sizes = [2, 96], strides = [1, 1]} : vector<2x128xf32> to vector<2x96xf32>
      %329 = arith.negf %328 : vector<2x96xf32>
      %330 = math.exp %329 : vector<2x96xf32>
      %cst_91 = arith.constant 1.000000e+00 : f32
      %331 = vector.broadcast %cst_91 : f32 to vector<2x96xf32>
      %332 = arith.addf %331, %330 : vector<2x96xf32>
      %333 = arith.divf %331, %332 : vector<2x96xf32>
      %334 = vector.extract_strided_slice %327 {offsets = [0, 96], sizes = [2, 32], strides = [1, 1]} : vector<2x128xf32> to vector<2x32xf32>
      %335 = math.tanh %334 : vector<2x32xf32>
      %336 = vector.extract_strided_slice %333 {offsets = [0, 32], sizes = [2, 32], strides = [1, 1]} : vector<2x96xf32> to vector<2x32xf32>
      %337 = arith.mulf %336, %286 : vector<2x32xf32>
      %338 = vector.extract_strided_slice %333 {offsets = [0, 0], sizes = [2, 32], strides = [1, 1]} : vector<2x96xf32> to vector<2x32xf32>
      %339 = arith.mulf %338, %335 : vector<2x32xf32>
      %340 = arith.addf %337, %339 : vector<2x32xf32>
      %341 = vector.extract_strided_slice %333 {offsets = [0, 64], sizes = [2, 32], strides = [1, 1]} : vector<2x96xf32> to vector<2x32xf32>
      %342 = math.tanh %340 : vector<2x32xf32>
      %343 = arith.mulf %341, %342 : vector<2x32xf32>
      %c5_i32 = arith.constant 5 : i32
      %344 = arith.addi %0, %c5_i32 : i32
      %345 = vector.broadcast %344 : i32 to vector<2x1xi32>
      %346 = arith.cmpi slt, %345, %11 : vector<2x1xi32>
      %cst_92 = arith.constant 0.000000e+00 : f32
      %347 = vector.shape_cast %346 : vector<2x1xi1> to vector<2x1xi1>
      %348 = vector.broadcast %347 : vector<2x1xi1> to vector<2x32xi1>
      %349 = vector.broadcast %cst_92 : f32 to vector<2x32xf32>
      %350 = arith.select %348, %343, %349 : vector<2x32xi1>, vector<2x32xf32>
      %c5_93 = arith.constant 5 : index
      %c0_94 = arith.constant 0 : index
      %c0_95 = arith.constant 0 : index
      %351 = vector.load %arg7[%c5_93, %c0_94, %c0_95] : memref<8x2x32xf32, #tpu.memory_space<vmem>>, vector<1x2x32xf32>
      %352 = vector.shape_cast %351 : vector<1x2x32xf32> to vector<2x32xf32>
      %353 = vector.shape_cast %350 : vector<2x32xf32> to vector<1x2x32xf32>
      tpu.vector_store %arg7[%c5_93, %c0_94, %c0_95], %353 {strides = array<i32>} : memref<8x2x32xf32, #tpu.memory_space<vmem>>, vector<1x2x32xf32>,
      %354 = arith.truncf %323 : vector<2x32xf32> to vector<2x32xbf16>
      %cst_96 = arith.constant dense<0.000000e+00> : vector<2x128xf32>
      %355 = tpu.matmul %354, %13, %cst_96 {dimension_numbers = #tpu.dot_dimension_numbers<[1], [0], [0], [1], [0, 0, 1, 1], [], []>} : vector<2x32xbf16>, vector<32x128xbf16>, vector<2x128xf32> -> vector<2x128xf32>
      %356 = arith.truncf %343 : vector<2x32xf32> to vector<2x32xbf16>
      %cst_97 = arith.constant dense<0.000000e+00> : vector<2x128xf32>
      %357 = tpu.matmul %356, %15, %cst_97 {dimension_numbers = #tpu.dot_dimension_numbers<[1], [0], [0], [1], [0, 0, 1, 1], [], []>} : vector<2x32xbf16>, vector<32x128xbf16>, vector<2x128xf32> -> vector<2x128xf32>
      %c6 = arith.constant 6 : index
      %c0_98 = arith.constant 0 : index
      %c0_99 = arith.constant 0 : index
      %358 = vector.load %arg2[%c6, %c0_98, %c0_99] : memref<8x2x128xbf16, #tpu.memory_space<vmem>>, vector<1x2x128xbf16>
      %359 = vector.shape_cast %358 : vector<1x2x128xbf16> to vector<2x128xbf16>
      %360 = arith.extf %359 : vector<2x128xbf16> to vector<2x128xf32>
      %361 = arith.addf %360, %355 : vector<2x128xf32>
      %362 = vector.extract_strided_slice %361 {offsets = [0, 0], sizes = [2, 96], strides = [1, 1]} : vector<2x128xf32> to vector<2x96xf32>
      %363 = arith.negf %362 : vector<2x96xf32>
      %364 = math.exp %363 : vector<2x96xf32>
      %cst_100 = arith.constant 1.000000e+00 : f32
      %365 = vector.broadcast %cst_100 : f32 to vector<2x96xf32>
      %366 = arith.addf %365, %364 : vector<2x96xf32>
      %367 = arith.divf %365, %366 : vector<2x96xf32>
      %368 = vector.extract_strided_slice %361 {offsets = [0, 96], sizes = [2, 32], strides = [1, 1]} : vector<2x128xf32> to vector<2x32xf32>
      %369 = math.tanh %368 : vector<2x32xf32>
      %370 = vector.extract_strided_slice %367 {offsets = [0, 32], sizes = [2, 32], strides = [1, 1]} : vector<2x96xf32> to vector<2x32xf32>
      %371 = arith.mulf %370, %320 : vector<2x32xf32>
      %372 = vector.extract_strided_slice %367 {offsets = [0, 0], sizes = [2, 32], strides = [1, 1]} : vector<2x96xf32> to vector<2x32xf32>
      %373 = arith.mulf %372, %369 : vector<2x32xf32>
      %374 = arith.addf %371, %373 : vector<2x32xf32>
      %375 = vector.extract_strided_slice %367 {offsets = [0, 64], sizes = [2, 32], strides = [1, 1]} : vector<2x96xf32> to vector<2x32xf32>
      %376 = math.tanh %374 : vector<2x32xf32>
      %377 = arith.mulf %375, %376 : vector<2x32xf32>
      %378 = arith.truncf %377 : vector<2x32xf32> to vector<2x32xbf16>
      %cst_101 = arith.constant dense<0.000000e+00> : vector<2x128xf32>
      %379 = tpu.matmul %378, %17, %cst_101 {dimension_numbers = #tpu.dot_dimension_numbers<[1], [0], [0], [1], [0, 0, 1, 1], [], []>} : vector<2x32xbf16>, vector<32x128xbf16>, vector<2x128xf32> -> vector<2x128xf32>
      %380 = arith.addf %379, %357 : vector<2x128xf32>
      %381 = arith.addf %380, %21 : vector<2x128xf32>
      %382 = vector.extract_strided_slice %381 {offsets = [0, 0], sizes = [2, 96], strides = [1, 1]} : vector<2x128xf32> to vector<2x96xf32>
      %383 = arith.negf %382 : vector<2x96xf32>
      %384 = math.exp %383 : vector<2x96xf32>
      %cst_102 = arith.constant 1.000000e+00 : f32
      %385 = vector.broadcast %cst_102 : f32 to vector<2x96xf32>
      %386 = arith.addf %385, %384 : vector<2x96xf32>
      %387 = arith.divf %385, %386 : vector<2x96xf32>
      %388 = vector.extract_strided_slice %381 {offsets = [0, 96], sizes = [2, 32], strides = [1, 1]} : vector<2x128xf32> to vector<2x32xf32>
      %389 = math.tanh %388 : vector<2x32xf32>
      %390 = vector.extract_strided_slice %387 {offsets = [0, 32], sizes = [2, 32], strides = [1, 1]} : vector<2x96xf32> to vector<2x32xf32>
      %391 = arith.mulf %390, %340 : vector<2x32xf32>
      %392 = vector.extract_strided_slice %387 {offsets = [0, 0], sizes = [2, 32], strides = [1, 1]} : vector<2x96xf32> to vector<2x32xf32>
      %393 = arith.mulf %392, %389 : vector<2x32xf32>
      %394 = arith.addf %391, %393 : vector<2x32xf32>
      %395 = vector.extract_strided_slice %387 {offsets = [0, 64], sizes = [2, 32], strides = [1, 1]} : vector<2x96xf32> to vector<2x32xf32>
      %396 = math.tanh %394 : vector<2x32xf32>
      %397 = arith.mulf %395, %396 : vector<2x32xf32>
      %c6_i32 = arith.constant 6 : i32
      %398 = arith.addi %0, %c6_i32 : i32
      %399 = vector.broadcast %398 : i32 to vector<2x1xi32>
      %400 = arith.cmpi slt, %399, %11 : vector<2x1xi32>
      %cst_103 = arith.constant 0.000000e+00 : f32
      %401 = vector.shape_cast %400 : vector<2x1xi1> to vector<2x1xi1>
      %402 = vector.broadcast %401 : vector<2x1xi1> to vector<2x32xi1>
      %403 = vector.broadcast %cst_103 : f32 to vector<2x32xf32>
      %404 = arith.select %402, %397, %403 : vector<2x32xi1>, vector<2x32xf32>
      %c6_104 = arith.constant 6 : index
      %c0_105 = arith.constant 0 : index
      %c0_106 = arith.constant 0 : index
      %405 = vector.load %arg7[%c6_104, %c0_105, %c0_106] : memref<8x2x32xf32, #tpu.memory_space<vmem>>, vector<1x2x32xf32>
      %406 = vector.shape_cast %405 : vector<1x2x32xf32> to vector<2x32xf32>
      %407 = vector.shape_cast %404 : vector<2x32xf32> to vector<1x2x32xf32>
      tpu.vector_store %arg7[%c6_104, %c0_105, %c0_106], %407 {strides = array<i32>} : memref<8x2x32xf32, #tpu.memory_space<vmem>>, vector<1x2x32xf32>,
      %408 = arith.truncf %377 : vector<2x32xf32> to vector<2x32xbf16>
      %cst_107 = arith.constant dense<0.000000e+00> : vector<2x128xf32>
      %409 = tpu.matmul %408, %13, %cst_107 {dimension_numbers = #tpu.dot_dimension_numbers<[1], [0], [0], [1], [0, 0, 1, 1], [], []>} : vector<2x32xbf16>, vector<32x128xbf16>, vector<2x128xf32> -> vector<2x128xf32>
      %410 = arith.truncf %397 : vector<2x32xf32> to vector<2x32xbf16>
      %cst_108 = arith.constant dense<0.000000e+00> : vector<2x128xf32>
      %411 = tpu.matmul %410, %15, %cst_108 {dimension_numbers = #tpu.dot_dimension_numbers<[1], [0], [0], [1], [0, 0, 1, 1], [], []>} : vector<2x32xbf16>, vector<32x128xbf16>, vector<2x128xf32> -> vector<2x128xf32>
      %c7 = arith.constant 7 : index
      %c0_109 = arith.constant 0 : index
      %c0_110 = arith.constant 0 : index
      %412 = vector.load %arg2[%c7, %c0_109, %c0_110] : memref<8x2x128xbf16, #tpu.memory_space<vmem>>, vector<1x2x128xbf16>
      %413 = vector.shape_cast %412 : vector<1x2x128xbf16> to vector<2x128xbf16>
      %414 = arith.extf %413 : vector<2x128xbf16> to vector<2x128xf32>
      %415 = arith.addf %414, %409 : vector<2x128xf32>
      %416 = vector.extract_strided_slice %415 {offsets = [0, 0], sizes = [2, 96], strides = [1, 1]} : vector<2x128xf32> to vector<2x96xf32>
      %417 = arith.negf %416 : vector<2x96xf32>
      %418 = math.exp %417 : vector<2x96xf32>
      %cst_111 = arith.constant 1.000000e+00 : f32
      %419 = vector.broadcast %cst_111 : f32 to vector<2x96xf32>
      %420 = arith.addf %419, %418 : vector<2x96xf32>
      %421 = arith.divf %419, %420 : vector<2x96xf32>
      %422 = vector.extract_strided_slice %415 {offsets = [0, 96], sizes = [2, 32], strides = [1, 1]} : vector<2x128xf32> to vector<2x32xf32>
      %423 = math.tanh %422 : vector<2x32xf32>
      %424 = vector.extract_strided_slice %421 {offsets = [0, 32], sizes = [2, 32], strides = [1, 1]} : vector<2x96xf32> to vector<2x32xf32>
      %425 = arith.mulf %424, %374 : vector<2x32xf32>
      %426 = vector.extract_strided_slice %421 {offsets = [0, 0], sizes = [2, 32], strides = [1, 1]} : vector<2x96xf32> to vector<2x32xf32>
      %427 = arith.mulf %426, %423 : vector<2x32xf32>
      %428 = arith.addf %425, %427 : vector<2x32xf32>
      %429 = vector.extract_strided_slice %421 {offsets = [0, 64], sizes = [2, 32], strides = [1, 1]} : vector<2x96xf32> to vector<2x32xf32>
      %430 = math.tanh %428 : vector<2x32xf32>
      %431 = arith.mulf %429, %430 : vector<2x32xf32>
      %432 = arith.truncf %431 : vector<2x32xf32> to vector<2x32xbf16>
      %cst_112 = arith.constant dense<0.000000e+00> : vector<2x128xf32>
      %433 = tpu.matmul %432, %17, %cst_112 {dimension_numbers = #tpu.dot_dimension_numbers<[1], [0], [0], [1], [0, 0, 1, 1], [], []>} : vector<2x32xbf16>, vector<32x128xbf16>, vector<2x128xf32> -> vector<2x128xf32>
      %434 = arith.addf %433, %411 : vector<2x128xf32>
      %435 = arith.addf %434, %21 : vector<2x128xf32>
      %436 = vector.extract_strided_slice %435 {offsets = [0, 0], sizes = [2, 96], strides = [1, 1]} : vector<2x128xf32> to vector<2x96xf32>
      %437 = arith.negf %436 : vector<2x96xf32>
      %438 = math.exp %437 : vector<2x96xf32>
      %cst_113 = arith.constant 1.000000e+00 : f32
      %439 = vector.broadcast %cst_113 : f32 to vector<2x96xf32>
      %440 = arith.addf %439, %438 : vector<2x96xf32>
      %441 = arith.divf %439, %440 : vector<2x96xf32>
      %442 = vector.extract_strided_slice %435 {offsets = [0, 96], sizes = [2, 32], strides = [1, 1]} : vector<2x128xf32> to vector<2x32xf32>
      %443 = math.tanh %442 : vector<2x32xf32>
      %444 = vector.extract_strided_slice %441 {offsets = [0, 32], sizes = [2, 32], strides = [1, 1]} : vector<2x96xf32> to vector<2x32xf32>
      %445 = arith.mulf %444, %394 : vector<2x32xf32>
      %446 = vector.extract_strided_slice %441 {offsets = [0, 0], sizes = [2, 32], strides = [1, 1]} : vector<2x96xf32> to vector<2x32xf32>
      %447 = arith.mulf %446, %443 : vector<2x32xf32>
      %448 = arith.addf %445, %447 : vector<2x32xf32>
      %449 = vector.extract_strided_slice %441 {offsets = [0, 64], sizes = [2, 32], strides = [1, 1]} : vector<2x96xf32> to vector<2x32xf32>
      %450 = math.tanh %448 : vector<2x32xf32>
      %451 = arith.mulf %449, %450 : vector<2x32xf32>
      %c7_i32 = arith.constant 7 : i32
      %452 = arith.addi %0, %c7_i32 : i32
      %453 = vector.broadcast %452 : i32 to vector<2x1xi32>
      %454 = arith.cmpi slt, %453, %11 : vector<2x1xi32>
      %cst_114 = arith.constant 0.000000e+00 : f32
      %455 = vector.shape_cast %454 : vector<2x1xi1> to vector<2x1xi1>
      %456 = vector.broadcast %455 : vector<2x1xi1> to vector<2x32xi1>
      %457 = vector.broadcast %cst_114 : f32 to vector<2x32xf32>
      %458 = arith.select %456, %451, %457 : vector<2x32xi1>, vector<2x32xf32>
      %c7_115 = arith.constant 7 : index
      %c0_116 = arith.constant 0 : index
      %c0_117 = arith.constant 0 : index
      %459 = vector.load %arg7[%c7_115, %c0_116, %c0_117] : memref<8x2x32xf32, #tpu.memory_space<vmem>>, vector<1x2x32xf32>
      %460 = vector.shape_cast %459 : vector<1x2x32xf32> to vector<2x32xf32>
      %461 = vector.shape_cast %458 : vector<2x32xf32> to vector<1x2x32xf32>
      tpu.vector_store %arg7[%c7_115, %c0_116, %c0_117], %461 {strides = array<i32>} : memref<8x2x32xf32, #tpu.memory_space<vmem>>, vector<1x2x32xf32>,
      %c0_118 = arith.constant 0 : index
      %c0_119 = arith.constant 0 : index
      %c0_120 = arith.constant 0 : index
      %462 = vector.load %arg8[%c0_118, %c0_119, %c0_120] : memref<2x2x32xf32, #tpu.memory_space<vmem>>, vector<1x2x32xf32>
      %463 = vector.shape_cast %462 : vector<1x2x32xf32> to vector<2x32xf32>
      %464 = vector.shape_cast %431 : vector<2x32xf32> to vector<1x2x32xf32>
      tpu.vector_store %arg8[%c0_118, %c0_119, %c0_120], %464 {strides = array<i32>} : memref<2x2x32xf32, #tpu.memory_space<vmem>>, vector<1x2x32xf32>,
      %c0_121 = arith.constant 0 : index
      %c0_122 = arith.constant 0 : index
      %c0_123 = arith.constant 0 : index
      %465 = vector.load %arg9[%c0_121, %c0_122, %c0_123] : memref<2x2x32xf32, #tpu.memory_space<vmem>>, vector<1x2x32xf32>
      %466 = vector.shape_cast %465 : vector<1x2x32xf32> to vector<2x32xf32>
      %467 = vector.shape_cast %428 : vector<2x32xf32> to vector<1x2x32xf32>
      tpu.vector_store %arg9[%c0_121, %c0_122, %c0_123], %467 {strides = array<i32>} : memref<2x2x32xf32, #tpu.memory_space<vmem>>, vector<1x2x32xf32>,
      %c1_124 = arith.constant 1 : index
      %c0_125 = arith.constant 0 : index
      %c0_126 = arith.constant 0 : index
      %468 = vector.load %arg8[%c1_124, %c0_125, %c0_126] : memref<2x2x32xf32, #tpu.memory_space<vmem>>, vector<1x2x32xf32>
      %469 = vector.shape_cast %468 : vector<1x2x32xf32> to vector<2x32xf32>
      %470 = vector.shape_cast %451 : vector<2x32xf32> to vector<1x2x32xf32>
      tpu.vector_store %arg8[%c1_124, %c0_125, %c0_126], %470 {strides = array<i32>} : memref<2x2x32xf32, #tpu.memory_space<vmem>>, vector<1x2x32xf32>,
      %c1_127 = arith.constant 1 : index
      %c0_128 = arith.constant 0 : index
      %c0_129 = arith.constant 0 : index
      %471 = vector.load %arg9[%c1_127, %c0_128, %c0_129] : memref<2x2x32xf32, #tpu.memory_space<vmem>>, vector<1x2x32xf32>
      %472 = vector.shape_cast %471 : vector<1x2x32xf32> to vector<2x32xf32>
      %473 = vector.shape_cast %448 : vector<2x32xf32> to vector<1x2x32xf32>
      tpu.vector_store %arg9[%c1_127, %c0_128, %c0_129], %473 {strides = array<i32>} : memref<2x2x32xf32, #tpu.memory_space<vmem>>, vector<1x2x32xf32>,
    } else {
    }
    return
  }
  func.func @transform_0(%arg0: i32, %arg1: memref<1xi32, #tpu.memory_space<smem>>) -> (i32, i32, i32) {
    %c0_i32 = arith.constant 0 : i32
    %c0_i32_0 = arith.constant 0 : i32
    %c0_i32_1 = arith.constant 0 : i32
    return %arg0, %c0_i32, %c0_i32_0 : i32, i32, i32
  }
  func.func @transform_1(%arg0: i32, %arg1: memref<1xi32, #tpu.memory_space<smem>>) -> (i32, i32, i32) {
    %c0_i32 = arith.constant 0 : i32
    %c0_i32_0 = arith.constant 0 : i32
    %c0_i32_1 = arith.constant 0 : i32
    %c0_i32_2 = arith.constant 0 : i32
    return %c0_i32, %c0_i32_0, %c0_i32_1 : i32, i32, i32
  }
  func.func @transform_2(%arg0: i32, %arg1: memref<1xi32, #tpu.memory_space<smem>>) -> (i32, i32, i32) {
    %c0_i32 = arith.constant 0 : i32
    %c0_i32_0 = arith.constant 0 : i32
    %c0_i32_1 = arith.constant 0 : i32
    %c0_i32_2 = arith.constant 0 : i32
    return %c0_i32, %c0_i32_0, %c0_i32_1 : i32, i32, i32
  }
  func.func @transform_3(%arg0: i32, %arg1: memref<1xi32, #tpu.memory_space<smem>>) -> (i32, i32, i32) {
    %c0_i32 = arith.constant 0 : i32
    %c0_i32_0 = arith.constant 0 : i32
    %c0_i32_1 = arith.constant 0 : i32
    %c0_i32_2 = arith.constant 0 : i32
    return %c0_i32, %c0_i32_0, %c0_i32_1 : i32, i32, i32
  }
  func.func @transform_4(%arg0: i32, %arg1: memref<1xi32, #tpu.memory_space<smem>>) -> (i32, i32) {
    %c0_i32 = arith.constant 0 : i32
    %c0_i32_0 = arith.constant 0 : i32
    %c0_i32_1 = arith.constant 0 : i32
    return %c0_i32, %c0_i32_0 : i32, i32
  }
  func.func @transform_5(%arg0: i32, %arg1: memref<1xi32, #tpu.memory_space<smem>>) -> (i32, i32, i32) {
    %c0_i32 = arith.constant 0 : i32
    %c0_i32_0 = arith.constant 0 : i32
    %c0_i32_1 = arith.constant 0 : i32
    return %arg0, %c0_i32, %c0_i32_0 : i32, i32, i32
  }
}

</mosaic_0001>

<bundles_post_ra>
// kernel: feature_extractor_forward.2
= control target key start
LH: loop header
LB: loop body
LE: loop exit
PB: predicated region body
PF: predicated region fallthrough
CT: control target
= control target key end

     0   :  { %vm30_vm0 = vcmask 1041408   ;;  %v110_v0 = vmov 0.0   ;;  %vm111_vm1 = vmmov 0   ;;  %vm26_vm2 = vcmask 31744   ;;  %s147_s1 = inlined_call_operand.vmem [shape: bf16[4,128], index: 1, kind: input, shape index: {}]   ;;  %s148_s0 = inlined_call_operand.vmem [shape: f32[16,4], index: 0, kind: input, shape index: {}]   ;;  %s149_s2 = inlined_call_operand.vmem [shape: f32[1,128], index: 2, kind: input, shape index: {}]   ;;  %s150_s3 = inlined_call_operand.vmem [shape: bf16[16,128], index: 3, kind: output, shape index: {}]  }
   0x1   :  { %102 = vmatprep.subr.bf16.mxu0 %v110_v0  ;;  %v18_v1 = vld [vmem:[%s147_s1] sm:$0x3]  ;;  %104 = vmatprep.mubr.msk.bf16.mxu0 %vm111_vm1, %v110_v0  ;;  %v16_v3 = vld [vmem:[%s148_s0 + $0x8] sm:$0xff] }
   0x2   :  { %v15_v2 = vld [vmem:[%s148_s0] sm:$0xff]  ;;  %v32_v4 = vsel %vm30_vm0, %v18_v1, 0 }
   0x3   :  { %v17_v5 = vpack.c.bf16 %v16_v3, %v15_v2  ;;  %103 = vmatpush3.bf16.msra.mxu0 %v32_v4  ;;  %v89_v6 = vld [vmem:[%s149_s2] ss:$0 sm:$0xff] }
   0x6   :  { %105 = vmatmul.mubr.msk.bf16.vlgmr.msra.gmra.mrb[0].mxu0 %vm26_vm2, %v17_v5 }
  0xd9   :  { %v68_v7 = vpop.f32.mrb[0].mxu0 }
  0xda   :  { %v106_v8 = vpop.f32.mrb[1].mxu0  ;;  %v69_v10 = vadd.f32 %v89_v6, %v68_v7 }
  0xdb   :  { %v71_v9 = vpop.f32.mrb[2].mxu0 }
  0xdc   :  { %v72_v11 = vadd.f32 %v89_v6, %v71_v9  ;;  %v107_v12 = vpop.f32.mrb[3].mxu0 }
  0xde   :  { %v98_v13 = vpack.c.bf16 %v72_v11, %v69_v10 }
  0xe0   :  { %99 = vst [vmem:[%s150_s3] sm:$0xff] %v98_v13  }

// kernel: feature_extractor_forward.3
= control target key start
LH: loop header
LB: loop body
LE: loop exit
PB: predicated region body
PF: predicated region fallthrough
CT: control target
= control target key end

     0   :  { %vm28_vm0 = vcmask 254976   ;;  %v2277_v0 = vmov 0.0   ;;  %s2831_s0 = inlined_call_operand.<no memory space> [shape: s32[1], index: 0, kind: input, shape index: {}]   ;;  %s2832_s1 = inlined_call_operand.vmem [shape: bf16[8,2,128], index: 1, kind: input, shape index: {}]   ;;  %s2833_s2 = inlined_call_operand.vmem [shape: bf16[1,32,128], index: 2, kind: input, shape index: {}]   ;;  %s2834_s3 = inlined_call_operand.vmem [shape: bf16[2,32,128], index: 3, kind: input, shape index: {}]   ;;  %s2835_s4 = inlined_call_operand.vmem [shape: f32[1,1,128], index: 4, kind: input, shape index: {}]   ;;  %s2836_s5 = inlined_call_operand.vmem [shape: s32[2,1], index: 5, kind: input, shape index: {}]   ;;  %s2837_s6 = inlined_call_operand.vmem [shape: f32[8,2,32], index: 6, kind: output, shape index: {}]  }
   0x1   :  { %29 = vst.msk [vmem:[#allocation2] sm:$0x3] %vm28_vm0, %v2277_v0  ;;  %30 = vst.msk [vmem:[#allocation2 + $0x2] sm:$0x3] %vm28_vm0, %v2277_v0  ;;  %p1784_p0 = scmp.gt.s32.totalorder %s2831_s0, 0 }
   0x2   :  { %31 = vst.msk [vmem:[#allocation3] sm:$0x3] %vm28_vm0, %v2277_v0  ;;  %32 = vst.msk [vmem:[#allocation3 + $0x2] sm:$0x3] %vm28_vm0, %v2277_v0  ;;  %v2278_v1 = vmov (!%p1784_p0), 0.0  }
   0x3   :  { %37 = sbr.rel (%p1784_p0) target bundleno = 10 (0xa), region = 29  ;;  %39 = vst.msk [vmem:[%s2837_s6] sm:$0x3] (!%p1784_p0), %vm28_vm0, %v2278_v1  ;;  %40 = vst.msk [vmem:[%s2837_s6 + $0x2] sm:$0x3] (!%p1784_p0), %vm28_vm0, %v2278_v1 }
   0x4   :  { %41 = vst.msk [vmem:[%s2837_s6 + $0x4] sm:$0x3] (!%p1784_p0), %vm28_vm0, %v2278_v1  ;;  %42 = vst.msk [vmem:[%s2837_s6 + $0x6] sm:$0x3] (!%p1784_p0), %vm28_vm0, %v2278_v1 }
   0x5   :  { %43 = vst.msk [vmem:[%s2837_s6 + $0x8] sm:$0x3] (!%p1784_p0), %vm28_vm0, %v2278_v1  ;;  %44 = vst.msk [vmem:[%s2837_s6 + $0xa] sm:$0x3] (!%p1784_p0), %vm28_vm0, %v2278_v1 }
   0x6   :  { %45 = vst.msk [vmem:[%s2837_s6 + $0xc] sm:$0x3] (!%p1784_p0), %vm28_vm0, %v2278_v1  ;;  %46 = vst.msk [vmem:[%s2837_s6 + $0xe] sm:$0x3] (!%p1784_p0), %vm28_vm0, %v2278_v1 }
   0xa PF:  { %p1786_p1 = scmp.le.s32.totalorder %s2831_s0, 0 }
   0xb   :  { %v2366_v2 = vld [vmem:[%s2834_s3] sm:$0xff] (!%p1786_p1)   ;;  %v2279_v3 = vmov (!%p1786_p1), 0.0   ;;  %v2374_v4 = vld [vmem:[%s2834_s3 + $0x8] sm:$0xff] (!%p1786_p1)   ;;  %vm2280_vm1 = vmmov (!%p1786_p1), 0   ;;  %vm91_vm2 = vcmask (!%p1786_p1), 261120   ;;  %s2281_s22 = smov (!%p1786_p1), 32  }
   0xc   :  { %50 = sbr.rel (%p1786_p1) target bundleno = 6395 (0x18fb), region = 33  ;;  %1933 = vmatprep.subr.bf16.mxu0 (!%p1786_p1), %v2279_v3  ;;  %1941 = vmatprep.subr.bf16.mxu1 (!%p1786_p1), %v2279_v3  ;;  %v72_v5 = vld [vmem:[#allocation2] sm:$0x3] (!%p1786_p1)  ;;  %v2398_v26 = vld [vmem:[%s2834_s3 + $0x10] sm:$0xff] (!%p1786_p1)   ;;  %v2409_v28 = vld [vmem:[%s2834_s3 + $0x18] sm:$0xff] (!%p1786_p1)   ;;  %s2282_s7 = smov (!%p1786_p1), 64  }
   0xd   :  { %1934 = vmatpush3.bf16.msra.mxu0 (!%p1786_p1), %v2366_v2  ;;  %1937 = vmatprep.mubr.msk.bf16.mxu0 (!%p1786_p1), %vm2280_vm1, %v2279_v3  ;;  %v78_v6 = vpack.c.bf16 (!%p1786_p1), %v72_v5, %v72_v5  ;;  %v191_v7 = vld [vmem:[%s2832_s1] sm:$0x1] (!%p1786_p1)  ;;  %v1799_v15 = vld.sshfl [vmem:[#allocation3] sm:$0x3 pattern:$0x76325410] (!%p1786_p1) }
   0xe   :  { %1935 = vmatprep.subr.bf16.mxu0 (!%p1786_p1), %v2279_v3  ;;  %1945 = vmatprep.mubr.msk.bf16.mxu1 (!%p1786_p1), %vm2280_vm1, %v2279_v3  ;;  %v192_v8 = vunpack.c.l.bf16 (!%p1786_p1), %v191_v7  ;;  %v2403_v27 = vld [vmem:[%s2833_s2] sm:$0xff] (!%p1786_p1)   ;;  %v2416_v30 = vld [vmem:[%s2833_s2 + $0x8] sm:$0xff] (!%p1786_p1)  }
   0xf   :  { %1942 = vmatpush3.bf16.msra.mxu1 (!%p1786_p1), %v2398_v26  ;;  %v74_v29 = vld [vmem:[#allocation2 + $0x2] sm:$0x3] (!%p1786_p1)  ;;  %v1807_v41 = vld [vmem:[%s2832_s1 + $0x1] sm:$0x1] (!%p1786_p1)  ;;  %v2452_v43 = vld [vmem:[%s2835_s4] ss:$0 sm:$0xff] (!%p1786_p1) }
  0x10   :  { %1943 = vmatprep.subr.bf16.mxu1 (!%p1786_p1), %v2279_v3  ;;  %v135_v31 = vpack.c.bf16 (!%p1786_p1), %v74_v29, %v74_v29  ;;  %v420_v42 = vunpack.c.l.bf16 (!%p1786_p1), %v1807_v41  ;;  %v77_v57 = vld [vmem:[#allocation3 + $0x2] sm:$0x3] (!%p1786_p1) }
  0x11   :  { %1936 = vmatpush3.bf16.msra.mxu0 (!%p1786_p1), %v2374_v4 }
  0x12   :  { %1949 = vmatprep.subr.bf16.mxu0 (!%p1786_p1), %v2279_v3 }
  0x13   :  { %1944 = vmatpush3.bf16.msra.mxu1 %v2409_v28 }
  0x14   :  { %1938 = vmatmul.mubr.msk.bf16.vlgmr.msra.gmra.mrb[0].mxu0 %vm91_vm2, %v78_v6  ;;  %1957 = vmatprep.subr.bf16.mxu1 %v2279_v3 }
  0x15   :  { %1953 = vmatprep.mubr.msk.bf16.mxu0 %vm2280_vm1, %v2279_v3  ;;  %1950 = vmatpush3.bf16.msra.mxu0 %v2403_v27 }
  0x16   :  { %1951 = vmatprep.subr.bf16.mxu0 %v2279_v3  ;;  %1946 = vmatmul.mubr.msk.bf16.vlgmr.msra.gmra.mrb[0].mxu1 %vm91_vm2, %v135_v31 }
  0x17   :  { %1958 = vmatpush3.bf16.msra.mxu1 %v2366_v2  ;;  %1961 = vmatprep.mubr.msk.bf16.mxu1 %vm2280_vm1, %v2279_v3 }
  0x18   :  { %1959 = vmatprep.subr.bf16.mxu1 %v2279_v3 }
  0x19   :  { %1952 = vmatpush3.bf16.msra.mxu0 %v2416_v30 }
  0x1a   :  { %1965 = vmatprep.subr.bf16.mxu0 %v2279_v3 }
  0x1b   :  { %1960 = vmatpush3.bf16.msra.mxu1 %v2374_v4 }
  0x1c   :  { %1973 = vmatprep.subr.bf16.mxu1 %v2279_v3 }
  0xe7   :  { %v129_v9 = vpop.f32.mrb[0].mxu0 }
  0xe8   :  { %v193_v10 = vadd.f32 %v192_v8, %v129_v9  ;;  %v1939_v11 = vpop.f32.mrb[1].mxu0 }
  0xe9   :  { %v132_v12 = vpop.f32.mrb[2].mxu0  ;;  %v185_v36 = vpop.f32.mrb[0].mxu1 }
  0xea   :  { %2142 = vtanh.f32 %v193_v10  ;;  %v1940_v13 = vpop.f32.mrb[3].mxu0  ;;  %v1798_v16 = vmul.f32 -1.442695, %v193_v10  ;;  %v1947_v37 = vpop.f32.mrb[1].mxu1 }
  0xeb   :  { %v188_v38 = vpop.f32.mrb[2].mxu1 }
  0xec   :  { %2144 = vpow2.f32 %v1798_v16  ;;  %v1948_v39 = vpop.f32.mrb[3].mxu1  ;;  %v1815_v38 = vld [vmem:[%s2832_s1 + $0x2] sm:$0x1] }
  0xed   :  { %v622_v41 = vunpack.c.l.bf16 %v1815_v38 }
  0xf4   :  { %v2143_v14 = vpop.eup %2142 }
  0xf5   :  { %214 = vrot.lane.b32.xlu0 %v2143_v14, %s2281_s22 }
  0xf6   :  { %v2145_v17 = vpop.eup %2144 }
  0xf7   :  { %v197_v18 = vadd.f32 1.0, %v2145_v17 }
  0xf9   :  { %209 = vrot.lane.b32.xlu0 %v1799_v15, %s2281_s22  ;;  %2146 = vrcp.f32 %v197_v18 }
 0x103   :  { %v2147_v19 = vpop.eup %2146 }
 0x167   :  { %v215_v20 = vpop.permute.xlu0 %214 }
 0x168   :  { %v217_v21 = vmul.f32 %v2147_v19, %v215_v20 }
 0x16a   :  { %219 = vrot.lane.b32.xlu1 %v217_v21, %s2281_s22 }
 0x16b   :  { %v210_v22 = vpop.permute.xlu0 %209 }
 0x16c   :  { %v212_v23 = vmul.f32 %v2147_v19, %v210_v22 }
 0x1dc   :  { %v220_v24 = vpop.permute.xlu1 %219 }
 0x1dd   :  { %v2392_v25 = vadd.f32 %v220_v24, %v212_v23 }
 0x1df   :  { %2148 = vtanh.f32 %v2392_v25 }
 0x1e9   :  { %v2149_v32 = vpop.eup %2148 }
 0x1ea   :  { %225 = vrot.lane.b32.xlu1 %v2149_v32, %s2281_s22 }
 0x25c   :  { %v226_v33 = vpop.permute.xlu1 %225 }
 0x25d   :  { %v228_v34 = vmul.f32 %v2147_v19, %v226_v33 }
 0x25f   :  { %v229_v35 = vpack.c.bf16 %v228_v34, %v228_v34 }
 0x261   :  { %231 = vrot.lane.b32.xlu0 %v229_v35, %s2282_s7 }
 0x2d3   :  { %v232_v40 = vpop.permute.xlu0 %231 }
 0x2d4   :  { %1954 = vmatmul.mubr.msk.bf16.vlgmr.msra.gmra.mrb[4].mxu0 %vm91_vm2, %v232_v40  ;;  %1962 = vmatmul.mubr.msk.bf16.vlgmr.msra.gmra.mrb[4].mxu1 %vm91_vm2, %v232_v40 }
 0x2d5   :  { %1974 = vmatpush3.bf16.msra.mxu1 %v2403_v27  ;;  %1966 = vmatpush3.bf16.msra.mxu0 %v2398_v26 }
 0x2d6   :  { %1975 = vmatprep.subr.bf16.mxu1 %v2279_v3  ;;  %1967 = vmatprep.subr.bf16.mxu0 %v2279_v3 }
 0x2d7   :  { %1977 = vmatprep.mubr.msk.bf16.mxu1 %vm2280_vm1, %v2279_v3  ;;  %1969 = vmatprep.mubr.msk.bf16.mxu0 %vm2280_vm1, %v2279_v3 }
 0x2d9   :  { %1976 = vmatpush3.bf16.msra.mxu1 %v2416_v30  ;;  %1968 = vmatpush3.bf16.msra.mxu0 %v2409_v28 }
 0x2da   :  { %1981 = vmatprep.subr.bf16.mxu0 %v2279_v3  ;;  %1989 = vmatprep.subr.bf16.mxu1 %v2279_v3 }
 0x3a7   :  { %v282_v44 = vpop.f32.mrb[4].mxu0  ;;  %v365_v45 = vpop.f32.mrb[4].mxu1 }
 0x3a8   :  { %v283_v46 = vadd.f32 %v282_v44, %v185_v36  ;;  %v421_v47 = vadd.f32 %v420_v42, %v365_v45  ;;  %v1955_v48 = vpop.f32.mrb[5].mxu0  ;;  %v1963_v49 = vpop.f32.mrb[5].mxu1 }
 0x3a9   :  { %v285_v50 = vpop.f32.mrb[6].mxu0  ;;  %v368_v51 = vpop.f32.mrb[6].mxu1 }
 0x3aa   :  { %v288_v52 = vadd.f32 %v2452_v43, %v283_v46  ;;  %2150 = vtanh.f32 %v421_v47  ;;  %v1956_v53 = vpop.f32.mrb[7].mxu0  ;;  %v1964_v54 = vpop.f32.mrb[7].mxu1  ;;  %v1808_v58 = vmul.f32 -1.442695, %v421_v47 }
 0x3ac   :  { %2152 = vtanh.f32 %v288_v52  ;;  %v1803_v59 = vmul.f32 -1.442695, %v288_v52 }
 0x3ad   :  { %2154 = vpow2.f32 %v1808_v58 }
 0x3ae   :  { %2156 = vpow2.f32 %v1803_v59 }
 0x3b4   :  { %v2151_v55 = vpop.eup %2150 }
 0x3b5   :  { %431 = vrot.lane.b32.xlu0 %v2151_v55, %s2281_s22 }
 0x3b6   :  { %v2153_v56 = vpop.eup %2152 }
 0x3b7   :  { %302 = vrot.lane.b32.xlu1 %v2153_v56, %s2281_s22  ;;  %v2155_v60 = vpop.eup %2154 }
 0x3b8   :  { %v2157_v61 = vpop.eup %2156  ;;  %v425_v62 = vadd.f32 1.0, %v2155_v60 }
 0x3b9   :  { %v292_v63 = vadd.f32 1.0, %v2157_v61 }
 0x3ba   :  { %2158 = vrcp.f32 %v425_v62 }
 0x3bb   :  { %297 = vrot.lane.b32.xlu1 %v77_v57, %s2281_s22  ;;  %2160 = vrcp.f32 %v292_v63 }
 0x3c4   :  { %v2159_v0 = vpop.eup %2158 }
 0x3c5   :  { %v2161_v6 = vpop.eup %2160  ;;  %v429_v10 = vmul.f32 %v2159_v0, %v2392_v25 }
 0x427   :  { %v432_v1 = vpop.permute.xlu0 %431 }
 0x428   :  { %v434_v5 = vmul.f32 %v2159_v0, %v432_v1 }
 0x429   :  { %v303_v7 = vpop.permute.xlu1 %302 }
 0x42a   :  { %v305_v8 = vmul.f32 %v2161_v6, %v303_v7  ;;  %436 = vrot.lane.b32.xlu1 %v434_v5, %s2281_s22 }
 0x42c   :  { %307 = vrot.lane.b32.xlu0 %v305_v8, %s2281_s22 }
 0x42d   :  { %v298_v9 = vpop.permute.xlu1 %297 }
 0x42e   :  { %v300_v12 = vmul.f32 %v2161_v6, %v298_v9 }
 0x49c   :  { %v437_v11 = vpop.permute.xlu1 %436 }
 0x49d   :  { %v2461_v13 = vadd.f32 %v437_v11, %v429_v10 }
 0x49e   :  { %v308_v14 = vpop.permute.xlu0 %307 }
 0x49f   :  { %2162 = vtanh.f32 %v2461_v13  ;;  %v2464_v15 = vadd.f32 %v308_v14, %v300_v12 }
 0x4a1   :  { %2164 = vtanh.f32 %v2464_v15 }
 0x4a9   :  { %v2163_v16 = vpop.eup %2162 }
 0x4aa   :  { %442 = vrot.lane.b32.xlu1 %v2163_v16, %s2281_s22 }
 0x4ab   :  { %v2165_v17 = vpop.eup %2164 }
 0x4ac   :  { %313 = vrot.lane.b32.xlu0 %v2165_v17, %s2281_s22 }
 0x51c   :  { %v443_v18 = vpop.permute.xlu1 %442 }
 0x51d   :  { %v445_v19 = vmul.f32 %v2159_v0, %v443_v18 }
 0x51e   :  { %v314_v20 = vpop.permute.xlu0 %313 }
 0x51f   :  { %v446_v21 = vpack.c.bf16 %v445_v19, %v445_v19  ;;  %v2469_v22 = vmul.f32 %v2161_v6, %v314_v20  ;;  %v1823_v20 = vld [vmem:[%s2832_s1 + $0x3] sm:$0x1] }
 0x521   :  { %v371_v23 = vpack.c.bf16 %v2469_v22, %v2469_v22  ;;  %448 = vrot.lane.b32.xlu1 %v446_v21, %s2282_s7 }
 0x523   :  { %373 = vrot.lane.b32.xlu0 %v371_v23, %s2282_s7  ;;  %v824_v23 = vunpack.c.l.bf16 %v1823_v20 }
 0x593   :  { %v449_v24 = vpop.permute.xlu1 %448 }
 0x594   :  { %1978 = vmatmul.mubr.msk.bf16.vlgmr.msra.gmra.mrb[8].mxu1 %vm91_vm2, %v449_v24 }
 0x595   :  { %v374_v25 = vpop.permute.xlu0 %373  ;;  %1990 = vmatpush3.bf16.msra.mxu1 %v2398_v26  ;;  %1993 = vmatprep.mubr.msk.bf16.mxu1 %vm2280_vm1, %v2279_v3 }
 0x596   :  { %1970 = vmatmul.mubr.msk.bf16.vlgmr.msra.gmra.mrb[8].mxu0 %vm91_vm2, %v374_v25  ;;  %1991 = vmatprep.subr.bf16.mxu1 %v2279_v3 }
 0x597   :  { %1982 = vmatpush3.bf16.msra.mxu0 %v2366_v2  ;;  %1985 = vmatprep.mubr.msk.bf16.mxu0 %vm2280_vm1, %v2279_v3 }
 0x598   :  { %1983 = vmatprep.subr.bf16.mxu0 %v2279_v3 }
 0x599   :  { %1992 = vmatpush3.bf16.msra.mxu1 %v2409_v28 }
 0x59a   :  { %2005 = vmatprep.subr.bf16.mxu1 %v2279_v3 }
 0x59b   :  { %1984 = vmatpush3.bf16.msra.mxu0 %v2374_v4 }
 0x59c   :  { %1997 = vmatprep.subr.bf16.mxu0 %v2279_v3 }
 0x59e   :  { %1986 = vmatmul.mubr.msk.bf16.vlgmr.msra.gmra.mrb[12].mxu0 %vm91_vm2, %v449_v24 }
 0x59f   :  { %1998 = vmatpush3.bf16.msra.mxu0 %v2403_v27  ;;  %2001 = vmatprep.mubr.msk.bf16.mxu0 %vm2280_vm1, %v2279_v3 }
 0x5a0   :  { %1999 = vmatprep.subr.bf16.mxu0 %v2279_v3 }
 0x5a3   :  { %2000 = vmatpush3.bf16.msra.mxu0 %v2416_v30 }
 0x5a4   :  { %2013 = vmatprep.subr.bf16.mxu0 %v2279_v3 }
 0x667   :  { %v487_v29 = vpop.f32.mrb[8].mxu1 }
 0x668   :  { %v1979_v31 = vpop.f32.mrb[9].mxu1 }
 0x669   :  { %v412_v32 = vpop.f32.mrb[8].mxu0  ;;  %v490_v33 = vpop.f32.mrb[10].mxu1 }
 0x66a   :  { %v488_v34 = vadd.f32 %v487_v29, %v412_v32  ;;  %v1971_v35 = vpop.f32.mrb[9].mxu0  ;;  %v1980_v36 = vpop.f32.mrb[11].mxu1 }
 0x66b   :  { %v415_v37 = vpop.f32.mrb[10].mxu0 }
 0x66c   :  { %v493_v39 = vadd.f32 %v2452_v43, %v488_v34  ;;  %v1972_v40 = vpop.f32.mrb[11].mxu0 }
 0x66e   :  { %2166 = vtanh.f32 %v493_v39  ;;  %v1810_v50 = vmul.f32 -1.442695, %v493_v39 }
 0x671   :  { %v567_v42 = vpop.f32.mrb[12].mxu0 }
 0x672   :  { %v623_v44 = vadd.f32 %v622_v41, %v567_v42  ;;  %v1987_v45 = vpop.f32.mrb[13].mxu0 }
 0x673   :  { %v570_v46 = vpop.f32.mrb[14].mxu0 }
 0x674   :  { %2168 = vtanh.f32 %v623_v44  ;;  %v1988_v47 = vpop.f32.mrb[15].mxu0  ;;  %v1816_v51 = vmul.f32 -1.442695, %v623_v44 }
 0x675   :  { %2170 = vpow2.f32 %v1810_v50 }
 0x676   :  { %2172 = vpow2.f32 %v1816_v51 }
 0x678   :  { %v2167_v48 = vpop.eup %2166 }
 0x679   :  { %503 = vrot.lane.b32.xlu0 %v2167_v48, %s2281_s22 }
 0x67e   :  { %v2169_v49 = vpop.eup %2168 }
 0x67f   :  { %633 = vrot.lane.b32.xlu1 %v2169_v49, %s2281_s22  ;;  %v2171_v52 = vpop.eup %2170 }
 0x680   :  { %v497_v53 = vadd.f32 1.0, %v2171_v52  ;;  %v2173_v54 = vpop.eup %2172 }
 0x681   :  { %v627_v55 = vadd.f32 1.0, %v2173_v54 }
 0x682   :  { %2174 = vrcp.f32 %v497_v53 }
 0x683   :  { %2176 = vrcp.f32 %v627_v55 }
 0x68c   :  { %v2175_v56 = vpop.eup %2174 }
 0x68d   :  { %v2177_v59 = vpop.eup %2176  ;;  %v501_v62 = vmul.f32 %v2175_v56, %v2464_v15 }
 0x68e   :  { %v631_v1 = vmul.f32 %v2177_v59, %v2461_v13 }
 0x6eb   :  { %v504_v57 = vpop.permute.xlu0 %503 }
 0x6ec   :  { %v506_v58 = vmul.f32 %v2175_v56, %v504_v57 }
 0x6ee   :  { %508 = vrot.lane.b32.xlu0 %v506_v58, %s2281_s22 }
 0x6f1   :  { %v634_v60 = vpop.permute.xlu1 %633 }
 0x6f2   :  { %v636_v61 = vmul.f32 %v2177_v59, %v634_v60 }
 0x6f4   :  { %638 = vrot.lane.b32.xlu1 %v636_v61, %s2281_s22 }
 0x760   :  { %v509_v63 = vpop.permute.xlu0 %508 }
 0x761   :  { %v2505_v0 = vadd.f32 %v509_v63, %v501_v62 }
 0x763   :  { %2178 = vtanh.f32 %v2505_v0 }
 0x766   :  { %v639_v5 = vpop.permute.xlu1 %638 }
 0x767   :  { %v2509_v6 = vadd.f32 %v639_v5, %v631_v1 }
 0x769   :  { %2180 = vtanh.f32 %v2509_v6 }
 0x76d   :  { %v2179_v7 = vpop.eup %2178 }
 0x76e   :  { %514 = vrot.lane.b32.xlu0 %v2179_v7, %s2281_s22 }
 0x773   :  { %v2181_v8 = vpop.eup %2180 }
 0x774   :  { %644 = vrot.lane.b32.xlu1 %v2181_v8, %s2281_s22 }
 0x7e0   :  { %v515_v9 = vpop.permute.xlu0 %514 }
 0x7e1   :  { %v2514_v10 = vmul.f32 %v2175_v56, %v515_v9 }
 0x7e3   :  { %v573_v11 = vpack.c.bf16 %v2514_v10, %v2514_v10 }
 0x7e5   :  { %575 = vrot.lane.b32.xlu0 %v573_v11, %s2282_s7 }
 0x7e6   :  { %v645_v12 = vpop.permute.xlu1 %644 }
 0x7e7   :  { %v647_v13 = vmul.f32 %v2177_v59, %v645_v12 }
 0x7e9   :  { %v648_v14 = vpack.c.bf16 %v647_v13, %v647_v13 }
 0x7eb   :  { %650 = vrot.lane.b32.xlu1 %v648_v14, %s2282_s7 }
 0x857   :  { %v576_v15 = vpop.permute.xlu0 %575 }
 0x858   :  { %1994 = vmatmul.mubr.msk.bf16.vlgmr.msra.gmra.mrb[12].mxu1 %vm91_vm2, %v576_v15 }
 0x859   :  { %2006 = vmatpush3.bf16.msra.mxu1 %v2366_v2  ;;  %2009 = vmatprep.mubr.msk.bf16.mxu1 %vm2280_vm1, %v2279_v3 }
 0x85a   :  { %2007 = vmatprep.subr.bf16.mxu1 %v2279_v3 }
 0x85d   :  { %2008 = vmatpush3.bf16.msra.mxu1 %v2374_v4  ;;  %v651_v16 = vpop.permute.xlu1 %650 }
 0x85e   :  { %2002 = vmatmul.mubr.msk.bf16.vlgmr.msra.gmra.mrb[16].mxu0 %vm91_vm2, %v651_v16  ;;  %2021 = vmatprep.subr.bf16.mxu1 %v2279_v3 }
 0x85f   :  { %2014 = vmatpush3.bf16.msra.mxu0 %v2398_v26  ;;  %2017 = vmatprep.mubr.msk.bf16.mxu0 %vm2280_vm1, %v2279_v3 }
 0x860   :  { %2010 = vmatmul.mubr.msk.bf16.vlgmr.msra.gmra.mrb[16].mxu1 %vm91_vm2, %v651_v16  ;;  %2015 = vmatprep.subr.bf16.mxu0 %v2279_v3  ;;  %v1831_v16 = vld [vmem:[%s2832_s1 + $0x4] sm:$0x1] }
 0x861   :  { %2022 = vmatpush3.bf16.msra.mxu1 %v2403_v27  ;;  %2025 = vmatprep.mubr.msk.bf16.mxu1 %vm2280_vm1, %v2279_v3 }
 0x862   :  { %2023 = vmatprep.subr.bf16.mxu1 %v2279_v3 }
 0x863   :  { %2016 = vmatpush3.bf16.msra.mxu0 %v2409_v28 }
 0x864   :  { %2029 = vmatprep.subr.bf16.mxu0 %v2279_v3 }
 0x865   :  { %2024 = vmatpush3.bf16.msra.mxu1 %v2416_v30 }
 0x866   :  { %2037 = vmatprep.subr.bf16.mxu1 %v2279_v3 }
 0x92b   :  { %v614_v17 = vpop.f32.mrb[12].mxu1 }
 0x92c   :  { %v1995_v18 = vpop.f32.mrb[13].mxu1 }
 0x92d   :  { %v617_v19 = vpop.f32.mrb[14].mxu1 }
 0x92e   :  { %v1996_v21 = vpop.f32.mrb[15].mxu1 }
 0x92f   :  { %v1026_v21 = vunpack.c.l.bf16 %v1831_v16 }
 0x931   :  { %v689_v24 = vpop.f32.mrb[16].mxu0 }
 0x932   :  { %v690_v25 = vadd.f32 %v689_v24, %v614_v17  ;;  %v2003_v29 = vpop.f32.mrb[17].mxu0 }
 0x933   :  { %v692_v31 = vpop.f32.mrb[18].mxu0  ;;  %v769_v32 = vpop.f32.mrb[16].mxu1 }
 0x934   :  { %v695_v33 = vadd.f32 %v2452_v43, %v690_v25  ;;  %v825_v34 = vadd.f32 %v824_v23, %v769_v32  ;;  %v2004_v35 = vpop.f32.mrb[19].mxu0  ;;  %v2011_v36 = vpop.f32.mrb[17].mxu1 }
 0x935   :  { %v772_v37 = vpop.f32.mrb[18].mxu1 }
 0x936   :  { %2182 = vtanh.f32 %v695_v33  ;;  %v2012_v38 = vpop.f32.mrb[19].mxu1  ;;  %v1818_v41 = vmul.f32 -1.442695, %v695_v33  ;;  %v1824_v42 = vmul.f32 -1.442695, %v825_v34 }
 0x937   :  { %2184 = vtanh.f32 %v825_v34 }
 0x938   :  { %2186 = vpow2.f32 %v1818_v41 }
 0x939   :  { %2188 = vpow2.f32 %v1824_v42 }
 0x940   :  { %v2183_v39 = vpop.eup %2182 }
 0x941   :  { %v2185_v40 = vpop.eup %2184  ;;  %705 = vrot.lane.b32.xlu0 %v2183_v39, %s2281_s22 }
 0x942   :  { %835 = vrot.lane.b32.xlu1 %v2185_v40, %s2281_s22  ;;  %v2187_v44 = vpop.eup %2186 }
 0x943   :  { %v2189_v45 = vpop.eup %2188  ;;  %v699_v46 = vadd.f32 1.0, %v2187_v44 }
 0x944   :  { %v829_v47 = vadd.f32 1.0, %v2189_v45 }
 0x945   :  { %2190 = vrcp.f32 %v699_v46 }
 0x946   :  { %2192 = vrcp.f32 %v829_v47 }
 0x94f   :  { %v2191_v48 = vpop.eup %2190 }
 0x950   :  { %v2193_v50 = vpop.eup %2192  ;;  %v703_v54 = vmul.f32 %v2191_v48, %v2505_v0 }
 0x951   :  { %v833_v55 = vmul.f32 %v2193_v50, %v2509_v6 }
 0x9b3   :  { %v706_v49 = vpop.permute.xlu0 %705 }
 0x9b4   :  { %v836_v51 = vpop.permute.xlu1 %835  ;;  %v708_v52 = vmul.f32 %v2191_v48, %v706_v49 }
 0x9b5   :  { %v838_v53 = vmul.f32 %v2193_v50, %v836_v51 }
 0x9b6   :  { %710 = vrot.lane.b32.xlu0 %v708_v52, %s2281_s22 }
 0x9b7   :  { %840 = vrot.lane.b32.xlu1 %v838_v53, %s2281_s22 }
 0xa28   :  { %v711_v56 = vpop.permute.xlu0 %710 }
 0xa29   :  { %v841_v57 = vpop.permute.xlu1 %840  ;;  %v2551_v58 = vadd.f32 %v711_v56, %v703_v54 }
 0xa2a   :  { %v2553_v59 = vadd.f32 %v841_v57, %v833_v55 }
 0xa2b   :  { %2194 = vtanh.f32 %v2551_v58 }
 0xa2c   :  { %2196 = vtanh.f32 %v2553_v59 }
 0xa35   :  { %v2195_v60 = vpop.eup %2194 }
 0xa36   :  { %v2197_v61 = vpop.eup %2196  ;;  %716 = vrot.lane.b32.xlu0 %v2195_v60, %s2281_s22 }
 0xa37   :  { %846 = vrot.lane.b32.xlu1 %v2197_v61, %s2281_s22 }
 0xaa8   :  { %v717_v62 = vpop.permute.xlu0 %716 }
 0xaa9   :  { %v847_v63 = vpop.permute.xlu1 %846  ;;  %v2559_v0 = vmul.f32 %v2191_v48, %v717_v62 }
 0xaaa   :  { %v849_v1 = vmul.f32 %v2193_v50, %v847_v63 }
 0xaab   :  { %v775_v5 = vpack.c.bf16 %v2559_v0, %v2559_v0 }
 0xaac   :  { %v850_v6 = vpack.c.bf16 %v849_v1, %v849_v1 }
 0xaad   :  { %777 = vrot.lane.b32.xlu0 %v775_v5, %s2282_s7 }
 0xaae   :  { %852 = vrot.lane.b32.xlu1 %v850_v6, %s2282_s7  ;;  %v1839_v6 = vld [vmem:[%s2832_s1 + $0x5] sm:$0x1] }
 0xb1f   :  { %v778_v7 = vpop.permute.xlu0 %777 }
 0xb20   :  { %v853_v8 = vpop.permute.xlu1 %852  ;;  %2018 = vmatmul.mubr.msk.bf16.vlgmr.msra.gmra.mrb[20].mxu0 %vm91_vm2, %v778_v7 }
 0xb21   :  { %2026 = vmatmul.mubr.msk.bf16.vlgmr.msra.gmra.mrb[20].mxu1 %vm91_vm2, %v853_v8  ;;  %2030 = vmatpush3.bf16.msra.mxu0 %v2366_v2 }
 0xb22   :  { %2031 = vmatprep.subr.bf16.mxu0 %v2279_v3  ;;  %2033 = vmatprep.mubr.msk.bf16.mxu0 %vm2280_vm1, %v2279_v3 }
 0xb23   :  { %2038 = vmatpush3.bf16.msra.mxu1 %v2398_v26  ;;  %2041 = vmatprep.mubr.msk.bf16.mxu1 %vm2280_vm1, %v2279_v3 }
 0xb24   :  { %2039 = vmatprep.subr.bf16.mxu1 %v2279_v3 }
 0xb25   :  { %2032 = vmatpush3.bf16.msra.mxu0 %v2374_v4 }
 0xb26   :  { %2045 = vmatprep.subr.bf16.mxu0 %v2279_v3 }
 0xb27   :  { %2040 = vmatpush3.bf16.msra.mxu1 %v2409_v28 }
 0xb28   :  { %2034 = vmatmul.mubr.msk.bf16.vlgmr.msra.gmra.mrb[24].mxu0 %vm91_vm2, %v853_v8  ;;  %2053 = vmatprep.subr.bf16.mxu1 %v2279_v3 }
 0xb29   :  { %2046 = vmatpush3.bf16.msra.mxu0 %v2403_v27  ;;  %2049 = vmatprep.mubr.msk.bf16.mxu0 %vm2280_vm1, %v2279_v3 }
 0xb2a   :  { %2047 = vmatprep.subr.bf16.mxu0 %v2279_v3 }
 0xb2d   :  { %2048 = vmatpush3.bf16.msra.mxu0 %v2416_v30 }
 0xb2e   :  { %2061 = vmatprep.subr.bf16.mxu0 %v2279_v3 }
 0xbf3   :  { %v816_v9 = vpop.f32.mrb[20].mxu0 }
 0xbf4   :  { %v891_v11 = vpop.f32.mrb[20].mxu1  ;;  %v2019_v12 = vpop.f32.mrb[21].mxu0 }
 0xbf5   :  { %v892_v13 = vadd.f32 %v891_v11, %v816_v9  ;;  %v2027_v14 = vpop.f32.mrb[21].mxu1  ;;  %v819_v15 = vpop.f32.mrb[22].mxu0  ;;  %v1228_v9 = vunpack.c.l.bf16 %v1839_v6 }
 0xbf6   :  { %v894_v17 = vpop.f32.mrb[22].mxu1  ;;  %v2020_v18 = vpop.f32.mrb[23].mxu0 }
 0xbf7   :  { %v897_v19 = vadd.f32 %v2452_v43, %v892_v13  ;;  %v2028_v20 = vpop.f32.mrb[23].mxu1 }
 0xbf9   :  { %2198 = vtanh.f32 %v897_v19  ;;  %v1826_v34 = vmul.f32 -1.442695, %v897_v19 }
 0xbfb   :  { %v971_v23 = vpop.f32.mrb[24].mxu0 }
 0xbfc   :  { %v1027_v24 = vadd.f32 %v1026_v21, %v971_v23  ;;  %v2035_v25 = vpop.f32.mrb[25].mxu0 }
 0xbfd   :  { %v974_v29 = vpop.f32.mrb[26].mxu0 }
 0xbfe   :  { %2200 = vtanh.f32 %v1027_v24  ;;  %v2036_v31 = vpop.f32.mrb[27].mxu0  ;;  %v1832_v35 = vmul.f32 -1.442695, %v1027_v24 }
 0xbff   :  { %2202 = vpow2.f32 %v1826_v34 }
 0xc00   :  { %2204 = vpow2.f32 %v1832_v35 }
 0xc03   :  { %v2199_v32 = vpop.eup %2198 }
 0xc04   :  { %907 = vrot.lane.b32.xlu0 %v2199_v32, %s2281_s22 }
 0xc08   :  { %v2201_v33 = vpop.eup %2200 }
 0xc09   :  { %1037 = vrot.lane.b32.xlu1 %v2201_v33, %s2281_s22  ;;  %v2203_v36 = vpop.eup %2202 }
 0xc0a   :  { %v901_v37 = vadd.f32 1.0, %v2203_v36  ;;  %v2205_v38 = vpop.eup %2204 }
 0xc0b   :  { %v1031_v39 = vadd.f32 1.0, %v2205_v38 }
 0xc0c   :  { %2206 = vrcp.f32 %v901_v37 }
 0xc0d   :  { %2208 = vrcp.f32 %v1031_v39 }
 0xc16   :  { %v2207_v40 = vpop.eup %2206 }
 0xc17   :  { %v2209_v44 = vpop.eup %2208  ;;  %v905_v47 = vmul.f32 %v2207_v40, %v2551_v58 }
 0xc18   :  { %v1035_v50 = vmul.f32 %v2209_v44, %v2553_v59 }
 0xc76   :  { %v908_v41 = vpop.permute.xlu0 %907 }
 0xc77   :  { %v910_v42 = vmul.f32 %v2207_v40, %v908_v41 }
 0xc79   :  { %912 = vrot.lane.b32.xlu0 %v910_v42, %s2281_s22 }
 0xc7b   :  { %v1038_v45 = vpop.permute.xlu1 %1037 }
 0xc7c   :  { %v1040_v46 = vmul.f32 %v2209_v44, %v1038_v45 }
 0xc7e   :  { %1042 = vrot.lane.b32.xlu1 %v1040_v46, %s2281_s22 }
 0xceb   :  { %v913_v48 = vpop.permute.xlu0 %912 }
 0xcec   :  { %v2595_v49 = vadd.f32 %v913_v48, %v905_v47 }
 0xcee   :  { %2210 = vtanh.f32 %v2595_v49 }
 0xcf0   :  { %v1043_v51 = vpop.permute.xlu1 %1042 }
 0xcf1   :  { %v2599_v52 = vadd.f32 %v1043_v51, %v1035_v50 }
 0xcf3   :  { %2212 = vtanh.f32 %v2599_v52 }
 0xcf8   :  { %v2211_v53 = vpop.eup %2210 }
 0xcf9   :  { %918 = vrot.lane.b32.xlu0 %v2211_v53, %s2281_s22 }
 0xcfd   :  { %v2213_v54 = vpop.eup %2212 }
 0xcfe   :  { %1048 = vrot.lane.b32.xlu1 %v2213_v54, %s2281_s22 }
 0xd6b   :  { %v919_v55 = vpop.permute.xlu0 %918 }
 0xd6c   :  { %v2604_v56 = vmul.f32 %v2207_v40, %v919_v55 }
 0xd6e   :  { %v977_v57 = vpack.c.bf16 %v2604_v56, %v2604_v56 }
 0xd70   :  { %979 = vrot.lane.b32.xlu0 %v977_v57, %s2282_s7  ;;  %v1049_v58 = vpop.permute.xlu1 %1048 }
 0xd71   :  { %v1051_v59 = vmul.f32 %v2209_v44, %v1049_v58 }
 0xd73   :  { %v1052_v60 = vpack.c.bf16 %v1051_v59, %v1051_v59 }
 0xd75   :  { %1054 = vrot.lane.b32.xlu1 %v1052_v60, %s2282_s7  ;;  %v1847_v60 = vld [vmem:[%s2832_s1 + $0x6] sm:$0x1] }
 0xde2   :  { %v980_v61 = vpop.permute.xlu0 %979 }
 0xde3   :  { %2042 = vmatmul.mubr.msk.bf16.vlgmr.msra.gmra.mrb[24].mxu1 %vm91_vm2, %v980_v61 }
 0xde4   :  { %2054 = vmatpush3.bf16.msra.mxu1 %v2366_v2  ;;  %2057 = vmatprep.mubr.msk.bf16.mxu1 %vm2280_vm1, %v2279_v3 }
 0xde5   :  { %2055 = vmatprep.subr.bf16.mxu1 %v2279_v3 }
 0xde7   :  { %v1055_v62 = vpop.permute.xlu1 %1054 }
 0xde8   :  { %2056 = vmatpush3.bf16.msra.mxu1 %v2374_v4  ;;  %2050 = vmatmul.mubr.msk.bf16.vlgmr.msra.gmra.mrb[28].mxu0 %vm91_vm2, %v1055_v62 }
 0xde9   :  { %2069 = vmatprep.subr.bf16.mxu1 %v2279_v3  ;;  %2062 = vmatpush3.bf16.msra.mxu0 %v2398_v26 }
 0xdea   :  { %2063 = vmatprep.subr.bf16.mxu0 %v2279_v3  ;;  %2065 = vmatprep.mubr.msk.bf16.mxu0 %vm2280_vm1, %v2279_v3 }
 0xdeb   :  { %2058 = vmatmul.mubr.msk.bf16.vlgmr.msra.gmra.mrb[28].mxu1 %vm91_vm2, %v1055_v62 }
 0xdec   :  { %2070 = vmatpush3.bf16.msra.mxu1 %v2403_v27  ;;  %2073 = vmatprep.mubr.msk.bf16.mxu1 %vm2280_vm1, %v2279_v3 }
 0xded   :  { %2071 = vmatprep.subr.bf16.mxu1 %v2279_v3  ;;  %2064 = vmatpush3.bf16.msra.mxu0 %v2409_v28 }
 0xdee   :  { %2077 = vmatprep.subr.bf16.mxu0 %v2279_v3 }
 0xdf0   :  { %2072 = vmatpush3.bf16.msra.mxu1 %v2416_v30 }
 0xdf1   :  { %2085 = vmatprep.subr.bf16.mxu1 %v2279_v3 }
 0xeb6   :  { %v1018_v63 = vpop.f32.mrb[24].mxu1 }
 0xeb7   :  { %v2043_v1 = vpop.f32.mrb[25].mxu1 }
 0xeb8   :  { %v1021_v5 = vpop.f32.mrb[26].mxu1  ;;  %v1430_v1 = vunpack.c.l.bf16 %v1847_v60 }
 0xeb9   :  { %v2044_v7 = vpop.f32.mrb[27].mxu1 }
 0xebb   :  { %v1093_v8 = vpop.f32.mrb[28].mxu0 }
 0xebc   :  { %v1094_v11 = vadd.f32 %v1093_v8, %v1018_v63  ;;  %v2051_v12 = vpop.f32.mrb[29].mxu0 }
 0xebd   :  { %v1096_v13 = vpop.f32.mrb[30].mxu0 }
 0xebe   :  { %v1099_v14 = vadd.f32 %v2452_v43, %v1094_v11  ;;  %v1173_v15 = vpop.f32.mrb[28].mxu1  ;;  %v2052_v16 = vpop.f32.mrb[31].mxu0 }
 0xebf   :  { %v1229_v17 = vadd.f32 %v1228_v9, %v1173_v15  ;;  %v2059_v18 = vpop.f32.mrb[29].mxu1 }
 0xec0   :  { %2214 = vtanh.f32 %v1099_v14  ;;  %v1176_v19 = vpop.f32.mrb[30].mxu1  ;;  %v1834_v24 = vmul.f32 -1.442695, %v1099_v14 }
 0xec1   :  { %2216 = vtanh.f32 %v1229_v17  ;;  %v2060_v20 = vpop.f32.mrb[31].mxu1  ;;  %v1840_v25 = vmul.f32 -1.442695, %v1229_v17 }
 0xec2   :  { %2218 = vpow2.f32 %v1834_v24 }
 0xec3   :  { %2220 = vpow2.f32 %v1840_v25 }
 0xeca   :  { %v2215_v21 = vpop.eup %2214 }
 0xecb   :  { %v2217_v23 = vpop.eup %2216  ;;  %1109 = vrot.lane.b32.xlu0 %v2215_v21, %s2281_s22 }
 0xecc   :  { %1239 = vrot.lane.b32.xlu1 %v2217_v23, %s2281_s22  ;;  %v2219_v29 = vpop.eup %2218 }
 0xecd   :  { %v2221_v31 = vpop.eup %2220  ;;  %v1103_v32 = vadd.f32 1.0, %v2219_v29 }
 0xece   :  { %v1233_v33 = vadd.f32 1.0, %v2221_v31 }
 0xecf   :  { %2222 = vrcp.f32 %v1103_v32 }
 0xed0   :  { %2224 = vrcp.f32 %v1233_v33 }
 0xed9   :  { %v2223_v34 = vpop.eup %2222 }
 0xeda   :  { %v2225_v36 = vpop.eup %2224  ;;  %v1107_v40 = vmul.f32 %v2223_v34, %v2595_v49 }
 0xedb   :  { %v1237_v41 = vmul.f32 %v2225_v36, %v2599_v52 }
 0xf3d   :  { %v1110_v35 = vpop.permute.xlu0 %1109 }
 0xf3e   :  { %v1240_v37 = vpop.permute.xlu1 %1239  ;;  %v1112_v38 = vmul.f32 %v2223_v34, %v1110_v35 }
 0xf3f   :  { %v1242_v39 = vmul.f32 %v2225_v36, %v1240_v37 }
 0xf40   :  { %1114 = vrot.lane.b32.xlu0 %v1112_v38, %s2281_s22 }
 0xf41   :  { %1244 = vrot.lane.b32.xlu1 %v1242_v39, %s2281_s22 }
 0xfb2   :  { %v1115_v42 = vpop.permute.xlu0 %1114 }
 0xfb3   :  { %v1245_v44 = vpop.permute.xlu1 %1244  ;;  %v2641_v45 = vadd.f32 %v1115_v42, %v1107_v40 }
 0xfb4   :  { %v2643_v46 = vadd.f32 %v1245_v44, %v1237_v41 }
 0xfb5   :  { %2226 = vtanh.f32 %v2641_v45 }
 0xfb6   :  { %2228 = vtanh.f32 %v2643_v46 }
 0xfbf   :  { %v2227_v47 = vpop.eup %2226 }
 0xfc0   :  { %v2229_v48 = vpop.eup %2228  ;;  %1120 = vrot.lane.b32.xlu0 %v2227_v47, %s2281_s22  ;;  %v2271_v47 = vld [vmem:[%s2834_s3 + $0x8] sm:$0xff]  }
 0xfc1   :  { %1250 = vrot.lane.b32.xlu1 %v2229_v48, %s2281_s22  ;;  %v2272_v48 = vld [vmem:[%s2834_s3 + $0x10] sm:$0xff]  }
0x1032   :  { %v1121_v50 = vpop.permute.xlu0 %1120 }
0x1033   :  { %v1251_v49 = vpop.permute.xlu1 %1250  ;;  %v2649_v51 = vmul.f32 %v2223_v34, %v1121_v50  ;;  %v2273_v50 = vld [vmem:[%s2833_s2] sm:$0xff]  }
0x1034   :  { %v1253_v52 = vmul.f32 %v2225_v36, %v1251_v49  ;;  %v2274_v49 = vld [vmem:[%s2834_s3 + $0x18] sm:$0xff]  }
0x1035   :  { %v1179_v53 = vpack.c.bf16 %v2649_v51, %v2649_v51 }
0x1036   :  { %v1254_v54 = vpack.c.bf16 %v1253_v52, %v1253_v52  ;;  %v2275_v52 = vld [vmem:[%s2833_s2 + $0x8] sm:$0xff]  }
0x1037   :  { %1181 = vrot.lane.b32.xlu0 %v1179_v53, %s2282_s7 }
0x1038   :  { %1256 = vrot.lane.b32.xlu1 %v1254_v54, %s2282_s7 }
0x10a9   :  { %v1182_v55 = vpop.permute.xlu0 %1181 }
0x10aa   :  { %v1257_v57 = vpop.permute.xlu1 %1256  ;;  %2066 = vmatmul.mubr.msk.bf16.vlgmr.msra.gmra.mrb[32].mxu0 %vm91_vm2, %v1182_v55 }
0x10ab   :  { %2074 = vmatmul.mubr.msk.bf16.vlgmr.msra.gmra.mrb[32].mxu1 %vm91_vm2, %v1257_v57  ;;  %2078 = vmatpush3.bf16.msra.mxu0 %v2366_v2 }
0x10ac   :  { %2079 = vmatprep.subr.bf16.mxu0 %v2279_v3  ;;  %2081 = vmatprep.mubr.msk.bf16.mxu0 %vm2280_vm1, %v2279_v3 }
0x10ad   :  { %2086 = vmatpush3.bf16.msra.mxu1 %v2398_v26  ;;  %2089 = vmatprep.mubr.msk.bf16.mxu1 %vm2280_vm1, %v2279_v3 }
0x10ae   :  { %2087 = vmatprep.subr.bf16.mxu1 %v2279_v3 }
0x10af   :  { %2080 = vmatpush3.bf16.msra.mxu0 %v2374_v4 }
0x10b0   :  { %2093 = vmatprep.subr.bf16.mxu0 %v2279_v3 }
0x10b1   :  { %2088 = vmatpush3.bf16.msra.mxu1 %v2409_v28 }
0x10b2   :  { %2082 = vmatmul.mubr.msk.bf16.vlgmr.msra.gmra.mrb[36].mxu0 %vm91_vm2, %v1257_v57  ;;  %2101 = vmatprep.subr.bf16.mxu1 %v2279_v3  ;;  %v1855_v57 = vld [vmem:[%s2832_s1 + $0x7] sm:$0x1] }
0x10b3   :  { %2094 = vmatpush3.bf16.msra.mxu0 %v2403_v27  ;;  %2097 = vmatprep.mubr.msk.bf16.mxu0 %vm2280_vm1, %v2279_v3 }
0x10b4   :  { %2095 = vmatprep.subr.bf16.mxu0 %v2279_v3 }
0x10b7   :  { %2096 = vmatpush3.bf16.msra.mxu0 %v2416_v30 }
0x10b8   :  { %2109 = vmatprep.subr.bf16.mxu0 %v2279_v3 }
0x117d   :  { %v1220_v2 = vpop.f32.mrb[32].mxu0 }
0x117e   :  { %v1295_v4 = vpop.f32.mrb[32].mxu1  ;;  %v2067_v26 = vpop.f32.mrb[33].mxu0 }
0x117f   :  { %v1296_v58 = vadd.f32 %v1295_v4, %v1220_v2  ;;  %v2075_v28 = vpop.f32.mrb[33].mxu1  ;;  %v1223_v59 = vpop.f32.mrb[34].mxu0 }
0x1180   :  { %v1298_v27 = vpop.f32.mrb[34].mxu1  ;;  %v2068_v61 = vpop.f32.mrb[35].mxu0 }
0x1181   :  { %v1301_v62 = vadd.f32 %v2452_v43, %v1296_v58  ;;  %v2076_v63 = vpop.f32.mrb[35].mxu1 }
0x1183   :  { %2230 = vtanh.f32 %v1301_v62  ;;  %v1842_v12 = vmul.f32 -1.442695, %v1301_v62 }
0x1185   :  { %v1375_v30 = vpop.f32.mrb[36].mxu0 }
0x1186   :  { %v1431_v5 = vadd.f32 %v1430_v1, %v1375_v30  ;;  %v2083_v6 = vpop.f32.mrb[37].mxu0 }
0x1187   :  { %v1378_v7 = vpop.f32.mrb[38].mxu0 }
0x1188   :  { %2232 = vtanh.f32 %v1431_v5  ;;  %v2084_v8 = vpop.f32.mrb[39].mxu0  ;;  %v1848_v13 = vmul.f32 -1.442695, %v1431_v5 }
0x1189   :  { %2234 = vpow2.f32 %v1842_v12 }
0x118a   :  { %2236 = vpow2.f32 %v1848_v13 }
0x118d   :  { %v2231_v9 = vpop.eup %2230 }
0x118e   :  { %1311 = vrot.lane.b32.xlu0 %v2231_v9, %s2281_s22 }
0x1192   :  { %v2233_v11 = vpop.eup %2232 }
0x1193   :  { %1441 = vrot.lane.b32.xlu1 %v2233_v11, %s2281_s22  ;;  %v2235_v14 = vpop.eup %2234 }
0x1194   :  { %v1305_v15 = vadd.f32 1.0, %v2235_v14  ;;  %v2237_v16 = vpop.eup %2236 }
0x1195   :  { %v1435_v17 = vadd.f32 1.0, %v2237_v16 }
0x1196   :  { %2238 = vrcp.f32 %v1305_v15 }
0x1197   :  { %2240 = vrcp.f32 %v1435_v17 }
0x11a0   :  { %v2239_v18 = vpop.eup %2238 }
0x11a1   :  { %v2241_v21 = vpop.eup %2240  ;;  %v1309_v25 = vmul.f32 %v2239_v18, %v2641_v45  ;;  %v2270_v45 = vld [vmem:[%s2834_s3] sm:$0xff]  }
0x11a2   :  { %v1439_v32 = vmul.f32 %v2241_v21, %v2643_v46 }
0x1200   :  { %v1312_v19 = vpop.permute.xlu0 %1311 }
0x1201   :  { %v1314_v20 = vmul.f32 %v2239_v18, %v1312_v19 }
0x1203   :  { %1316 = vrot.lane.b32.xlu0 %v1314_v20, %s2281_s22 }
0x1205   :  { %v1442_v23 = vpop.permute.xlu1 %1441 }
0x1206   :  { %v1444_v24 = vmul.f32 %v2241_v21, %v1442_v23 }
0x1208   :  { %1446 = vrot.lane.b32.xlu1 %v1444_v24, %s2281_s22 }
0x1275   :  { %v1317_v29 = vpop.permute.xlu0 %1316 }
0x1276   :  { %v2685_v31 = vadd.f32 %v1317_v29, %v1309_v25 }
0x1278   :  { %2242 = vtanh.f32 %v2685_v31 }
0x127a   :  { %v1447_v33 = vpop.permute.xlu1 %1446 }
0x127b   :  { %v2689_v34 = vadd.f32 %v1447_v33, %v1439_v32 }
0x127d   :  { %2244 = vtanh.f32 %v2689_v34 }
0x1282   :  { %v2243_v35 = vpop.eup %2242 }
0x1283   :  { %1322 = vrot.lane.b32.xlu0 %v2243_v35, %s2281_s22 }
0x1287   :  { %v2245_v36 = vpop.eup %2244 }
0x1288   :  { %1452 = vrot.lane.b32.xlu1 %v2245_v36, %s2281_s22 }
0x12f5   :  { %v1323_v37 = vpop.permute.xlu0 %1322 }
0x12f6   :  { %v2694_v38 = vmul.f32 %v2239_v18, %v1323_v37 }
0x12f8   :  { %v1381_v39 = vpack.c.bf16 %v2694_v38, %v2694_v38 }
0x12fa   :  { %1383 = vrot.lane.b32.xlu0 %v1381_v39, %s2282_s7  ;;  %v1453_v40 = vpop.permute.xlu1 %1452 }
0x12fb   :  { %v1455_v41 = vmul.f32 %v2241_v21, %v1453_v40  ;;  %v2283_v40 = vmov 0  }
0x12fc   :  { %2134 = vset.pattern.permute.xlu0 %v2283_v40  ;;  %2135 = vset.pattern.permute.xlu1 %v2283_v40 }
0x12fd   :  { %v1456_v42 = vpack.c.bf16 %v1455_v41, %v1455_v41 }
0x12ff   :  { %1458 = vrot.lane.b32.xlu1 %v1456_v42, %s2282_s7 }
0x136c   :  { %v1384_v44 = vpop.permute.xlu0 %1383 }
0x136d   :  { %2090 = vmatmul.mubr.msk.bf16.vlgmr.msra.gmra.mrb[36].mxu1 %vm91_vm2, %v1384_v44 }
0x136e   :  { %2102 = vmatpush3.bf16.msra.mxu1 %v2270_v45  ;;  %2105 = vmatprep.mubr.msk.bf16.mxu1 %vm2280_vm1, %v2279_v3 }
0x136f   :  { %2103 = vmatprep.subr.bf16.mxu1 %v2279_v3 }
0x1371   :  { %v1459_v46 = vpop.permute.xlu1 %1458 }
0x1372   :  { %2104 = vmatpush3.bf16.msra.mxu1 %v2271_v47  ;;  %2098 = vmatmul.mubr.msk.bf16.vlgmr.msra.gmra.mrb[40].mxu0 %vm91_vm2, %v1459_v46 }
0x1373   :  { %2117 = vmatprep.subr.bf16.mxu1 %v2279_v3  ;;  %2110 = vmatpush3.bf16.msra.mxu0 %v2272_v48 }
0x1374   :  { %2111 = vmatprep.subr.bf16.mxu0 %v2279_v3  ;;  %2113 = vmatprep.mubr.msk.bf16.mxu0 %vm2280_vm1, %v2279_v3 }
0x1375   :  { %2106 = vmatmul.mubr.msk.bf16.vlgmr.msra.gmra.mrb[40].mxu1 %vm91_vm2, %v1459_v46 }
0x1376   :  { %2118 = vmatpush3.bf16.msra.mxu1 %v2273_v50  ;;  %2121 = vmatprep.mubr.msk.bf16.mxu1 %vm2280_vm1, %v2279_v3 }
0x1377   :  { %2119 = vmatprep.subr.bf16.mxu1 %v2279_v3  ;;  %2112 = vmatpush3.bf16.msra.mxu0 %v2274_v49  ;;  %v1632_v3 = vunpack.c.l.bf16 %v1855_v57  ;;  %v2276_v49 = vld [vmem:[%s2835_s4] ss:$0 sm:$0xff] }
0x137a   :  { %2120 = vmatpush3.bf16.msra.mxu1 %v2275_v52 }
0x1440   :  { %v1422_v53 = vpop.f32.mrb[36].mxu1 }
0x1441   :  { %v2091_v54 = vpop.f32.mrb[37].mxu1 }
0x1442   :  { %v1425_v55 = vpop.f32.mrb[38].mxu1  ;;  %v51_v54 = vld [vmem:[%s2836_s5] sm:$0x3] }
0x1443   :  { %v2092_v2 = vpop.f32.mrb[39].mxu1  ;;  %vm1804_vm3 = vcmp.gt.s32.totalorder %v51_v54, 0  ;;  %vm1827_vm4 = vcmp.gt.s32.totalorder %v51_v54, 3  ;;  %vm1843_vm5 = vcmp.gt.s32.totalorder %v51_v54, 5  ;;  %vm1859_vm6 = vcmp.gt.s32.totalorder %v51_v54, 7 }
0x1444   :  { %v319_v57 = vsel %vm1804_vm3, 1, %v2283_v40  ;;  %v925_v2 = vsel %vm1827_vm4, 1, %v2283_v40  ;;  %vm1811_vm7 = vcmp.gt.s32.totalorder %v51_v54, 1  ;;  %vm1819_vm8 = vcmp.gt.s32.totalorder %v51_v54, 2 }
0x1445   :  { %v1497_v4 = vpop.f32.mrb[40].mxu0  ;;  %vm1835_vm9 = vcmp.gt.s32.totalorder %v51_v54, 4  ;;  %vm1851_vm10 = vcmp.gt.s32.totalorder %v51_v54, 6 }
0x1446   :  { %v1498_v26 = vadd.f32 %v1497_v4, %v1422_v53  ;;  %v2099_v58 = vpop.f32.mrb[41].mxu0  ;;  %v1329_v4 = vsel %vm1843_vm5, 1, %v2283_v40 }
0x1447   :  { %v1500_v28 = vpop.f32.mrb[42].mxu0 }
0x1448   :  { %v1503_v59 = vadd.f32 %v2452_v43, %v1498_v26  ;;  %v1577_v60 = vpop.f32.mrb[40].mxu1  ;;  %v2100_v27 = vpop.f32.mrb[43].mxu0 }
0x1449   :  { %v1633_v61 = vadd.f32 %v1632_v3, %v1577_v60  ;;  %v2107_v62 = vpop.f32.mrb[41].mxu1  ;;  %v1733_v3 = vsel %vm1859_vm6, 1, %v2283_v40 }
0x144a   :  { %2246 = vtanh.f32 %v1503_v59  ;;  %v1580_v63 = vpop.f32.mrb[42].mxu1  ;;  %v1850_v6 = vmul.f32 -1.442695, %v1503_v59  ;;  %v723_v62 = vsel %vm1819_vm8, 1, %v2283_v40 }
0x144b   :  { %2248 = vtanh.f32 %v1633_v61  ;;  %v2108_v1 = vpop.f32.mrb[43].mxu1  ;;  %v1856_v7 = vmul.f32 -1.442695, %v1633_v61  ;;  %v521_v61 = vsel %vm1811_vm7, 1, %v2283_v40  ;;  %v1127_v63 = vsel %vm1835_vm9, 1, %v2283_v40 }
0x144c   :  { %2250 = vpow2.f32 %v1850_v6  ;;  %v1531_v1 = vsel %vm1851_vm10, 1, %v2283_v40 }
0x144d   :  { %2252 = vpow2.f32 %v1856_v7 }
0x1454   :  { %v2247_v30 = vpop.eup %2246 }
0x1455   :  { %v2249_v5 = vpop.eup %2248  ;;  %1513 = vrot.lane.b32.xlu0 %v2247_v30, %s2281_s22 }
0x1456   :  { %1643 = vrot.lane.b32.xlu1 %v2249_v5, %s2281_s22  ;;  %v2251_v8 = vpop.eup %2250 }
0x1457   :  { %v2253_v43 = vpop.eup %2252  ;;  %v1507_v9 = vadd.f32 1.0, %v2251_v8 }
0x1458   :  { %v1637_v11 = vadd.f32 1.0, %v2253_v43 }
0x1459   :  { %2254 = vrcp.f32 %v1507_v9 }
0x145a   :  { %2256 = vrcp.f32 %v1637_v11 }
0x1463   :  { %v2255_v12 = vpop.eup %2254 }
0x1464   :  { %v2257_v14 = vpop.eup %2256  ;;  %v1511_v18 = vmul.f32 %v2255_v12, %v2685_v31 }
0x1465   :  { %v1641_v19 = vmul.f32 %v2257_v14, %v2689_v34 }
0x14c7   :  { %v1514_v13 = vpop.permute.xlu0 %1513 }
0x14c8   :  { %v1644_v15 = vpop.permute.xlu1 %1643  ;;  %v1516_v16 = vmul.f32 %v2255_v12, %v1514_v13 }
0x14c9   :  { %v1646_v17 = vmul.f32 %v2257_v14, %v1644_v15  ;;  %v2284_v15 = vmov 1983009808  }
0x14ca   :  { %1518 = vrot.lane.b32.xlu0 %v1516_v16, %s2281_s22  ;;  %v1747_v16 = vunpack.c.l.s4 %v2284_v15 }
0x14cb   :  { %1648 = vrot.lane.b32.xlu1 %v1646_v17, %s2281_s22 }
0x153c   :  { %v1519_v20 = vpop.permute.xlu0 %1518 }
0x153d   :  { %v1649_v21 = vpop.permute.xlu1 %1648  ;;  %v2741_v23 = vadd.f32 %v1519_v20, %v1511_v18 }
0x153e   :  { %v2743_v24 = vadd.f32 %v1649_v21, %v1641_v19  ;;  %v1748_v19 = vunpack.c.0.s8 %v1747_v16 }
0x153f   :  { %2258 = vtanh.f32 %v2741_v23 }
0x1540   :  { %2260 = vtanh.f32 %v2743_v24 }
0x1549   :  { %v2259_v25 = vpop.eup %2258 }
0x154a   :  { %v2261_v29 = vpop.eup %2260  ;;  %1524 = vrot.lane.b32.xlu0 %v2259_v25, %s2281_s22 }
0x154b   :  { %1654 = vrot.lane.b32.xlu1 %v2261_v29, %s2281_s22 }
0x15bc   :  { %v1525_v32 = vpop.permute.xlu0 %1524 }
0x15bd   :  { %v1655_v31 = vpop.permute.xlu1 %1654  ;;  %v2749_v33 = vmul.f32 %v2255_v12, %v1525_v32 }
0x15be   :  { %v2751_v34 = vmul.f32 %v2257_v14, %v1655_v31 }
0x15bf   :  { %v1583_v35 = vpack.c.bf16 %v2749_v33, %v2749_v33 }
0x15c0   :  { %v1658_v36 = vpack.c.bf16 %v2751_v34, %v2751_v34 }
0x15c1   :  { %1585 = vrot.lane.b32.xlu0 %v1583_v35, %s2282_s7 }
0x15c2   :  { %1660 = vrot.lane.b32.xlu1 %v1658_v36, %s2282_s7 }
0x1633   :  { %v1586_v37 = vpop.permute.xlu0 %1585 }
0x1634   :  { %v1661_v39 = vpop.permute.xlu1 %1660  ;;  %2114 = vmatmul.mubr.msk.bf16.vlgmr.msra.gmra.mrb[44].mxu0 %vm91_vm2, %v1586_v37 }
0x1635   :  { %2122 = vmatmul.mubr.msk.bf16.vlgmr.msra.gmra.mrb[44].mxu1 %vm91_vm2, %v1661_v39 }
0x1707   :  { %v1624_v41 = vpop.f32.mrb[44].mxu0 }
0x1708   :  { %v1699_v42 = vpop.f32.mrb[44].mxu1  ;;  %v2115_v44 = vpop.f32.mrb[45].mxu0 }
0x1709   :  { %v1700_v45 = vadd.f32 %v1699_v42, %v1624_v41  ;;  %v2123_v46 = vpop.f32.mrb[45].mxu1  ;;  %v1627_v47 = vpop.f32.mrb[46].mxu0 }
0x170a   :  { %v1702_v48 = vpop.f32.mrb[46].mxu1  ;;  %v2116_v50 = vpop.f32.mrb[47].mxu0 }
0x170b   :  { %v1705_v52 = vadd.f32 %v2276_v49, %v1700_v45  ;;  %v2124_v53 = vpop.f32.mrb[47].mxu1 }
0x170d   :  { %2262 = vtanh.f32 %v1705_v52  ;;  %v1858_v26 = vmul.f32 -1.442695, %v1705_v52 }
0x170f   :  { %2264 = vpow2.f32 %v1858_v26 }
0x1717   :  { %v2263_v55 = vpop.eup %2262 }
0x1718   :  { %1715 = vrot.lane.b32.xlu0 %v2263_v55, %s2281_s22 }
0x1719   :  { %v2265_v58 = vpop.eup %2264 }
0x171a   :  { %v1709_v28 = vadd.f32 1.0, %v2265_v58 }
0x171c   :  { %321 = vperm.xlu0 %2134, %v319_v57   ;;  %2266 = vrcp.f32 %v1709_v28 }
0x1720   :  { %927 = vperm.xlu0 %2134, %v925_v2  }
0x1724   :  { %1331 = vperm.xlu0 %2134, %v1329_v4  }
0x1726   :  { %v2768_v59 = vpop.eup %2266 }
0x1727   :  { %v1713_v6 = vmul.f32 %v2768_v59, %v2741_v23 }
0x1728   :  { %1735 = vperm.xlu0 %2134, %v1733_v3  }
0x178a   :  { %v1716_v60 = vpop.permute.xlu0 %1715 }
0x178b   :  { %v1718_v27 = vmul.f32 %v2768_v59, %v1716_v60 }
0x178d   :  { %1720 = vrot.lane.b32.xlu1 %v1718_v27, %s2281_s22 }
0x1791   :  { %523 = vperm.xlu1 %2135, %v521_v61  }
0x1795   :  { %725 = vperm.xlu1 %2135, %v723_v62  }
0x1799   :  { %1129 = vperm.xlu1 %2135, %v1127_v63  }
0x179b   :  { %v322_v30 = vpop.permute.xlu0 %321 }
0x179c   :  { %vm323_vm11 = vcmp.eq.s32.totalorder %v322_v30, 1 }
0x179d   :  { %v324_v5 = vsel %vm323_vm11, %v2469_v22, 0.0  ;;  %1533 = vperm.xlu1 %2135, %v1531_v1   ;;  %v1749_v22 = vlaneseq }
0x179e   :  { %326 = vrot.lane.b32.xlu0 %v324_v5, %s2282_s7 }
0x179f   :  { %v928_v8 = vpop.permute.xlu0 %927  ;;  %v1750_v20 = vshrl.u32 %v1749_v22, 7 }
0x17a0   :  { %vm929_vm13 = vcmp.eq.s32.totalorder %v928_v8, 1 }
0x17a1   :  { %v930_v21 = vsel %vm929_vm13, %v2604_v56, 0.0  ;;  %v1751_v29 = vsub.s32 %v1748_v19, %v1750_v20 }
0x17a3   :  { %v1332_v9 = vpop.permute.xlu0 %1331  ;;  %v1764_v56 = vrot.slane %v2743_v24, %v1751_v29  ;;  %v1752_v35 = vrot.slane %v2751_v34, %v1751_v29 }
0x17a4   :  { %vm1333_vm15 = vcmp.eq.s32.totalorder %v1332_v9, 1 }
0x17a7   :  { %v1736_v11 = vpop.permute.xlu0 %1735 }
0x17a8   :  { %vm1737_vm3 = vcmp.eq.s32.totalorder %v1736_v11, 1 }
0x17ff   :  { %v1721_v7 = vpop.permute.xlu1 %1720 }
0x1800   :  { %v1723_v43 = vadd.f32 %v1721_v7, %v1713_v6 }
0x1802   :  { %2268 = vtanh.f32 %v1723_v43 }
0x180c   :  { %v2269_v12 = vpop.eup %2268 }
0x180d   :  { %1726 = vrot.lane.b32.xlu1 %v2269_v12, %s2281_s22  ;;  %s2285_s22 = smov 96  }
0x1810   :  { %v524_v13 = vpop.permute.xlu1 %523  ;;  %v327_v14 = vpop.permute.xlu0 %326 }
0x1811   :  { %vm525_vm12 = vcmp.eq.s32.totalorder %v524_v13, 1  ;;  %330 = vst.msk [vmem:[%s2837_s6] sm:$0x3] %vm28_vm0, %v327_v14 }
0x1812   :  { %v526_v17 = vsel %vm525_vm12, %v2514_v10, 0.0  ;;  %v1334_v10 = vsel %vm1333_vm15, %v2694_v38, 0.0 }
0x1813   :  { %528 = vrot.lane.b32.xlu1 %v526_v17, %s2282_s7 }
0x1814   :  { %v726_v18 = vpop.permute.xlu1 %725 }
0x1815   :  { %vm727_vm14 = vcmp.eq.s32.totalorder %v726_v18, 1 }
0x1816   :  { %v728_v23 = vsel %vm727_vm14, %v2559_v0, 0.0 }
0x1817   :  { %730 = vrot.lane.b32.xlu0 %v728_v23, %s2282_s7  ;;  %932 = vrot.lane.b32.xlu1 %v930_v21, %s2282_s7 }
0x1818   :  { %v1130_v25 = vpop.permute.xlu1 %1129 }
0x1819   :  { %vm1131_vm1 = vcmp.eq.s32.totalorder %v1130_v25, 1 }
0x181a   :  { %v1132_v32 = vsel %vm1131_vm1, %v2649_v51, 0.0 }
0x181b   :  { %1134 = vrot.lane.b32.xlu0 %v1132_v32, %s2282_s7  ;;  %1336 = vrot.lane.b32.xlu1 %v1334_v10, %s2282_s7 }
0x181c   :  { %v1534_v31 = vpop.permute.xlu1 %1533 }
0x181d   :  { %vm1535_vm2 = vcmp.eq.s32.totalorder %v1534_v31, 1 }
0x181e   :  { %v1536_v0 = vsel %vm1535_vm2, %v2749_v33, 0.0 }
0x181f   :  { %1538 = vrot.lane.b32.xlu0 %v1536_v0, %s2282_s7  ;;  %1765 = vrot.lane.b32.xlu1 %v1764_v56, %s2285_s22 }
0x1823   :  { %1753 = vrot.lane.b32.xlu0 %v1752_v35, %s2282_s7 }
0x187f   :  { %v1727_v38 = vpop.permute.xlu1 %1726 }
0x1880   :  { %v1729_v51 = vmul.f32 %v2768_v59, %v1727_v38 }
0x1882   :  { %1770 = vrot.lane.b32.xlu0 %v1729_v51, %s2282_s7  ;;  %v1738_v36 = vsel %vm1737_vm3, %v1729_v51, 0.0 }
0x1883   :  { %1740 = vrot.lane.b32.xlu1 %v1738_v36, %s2282_s7 }
0x1885   :  { %v529_v24 = vpop.permute.xlu1 %528 }
0x1886   :  { %1812 = vst.msk [vmem:[%s2837_s6 + $0x2] sm:$0x3] %vm28_vm0, %v529_v24 }
0x1887   :  { %1775 = vrot.lane.b32.xlu1 %v1723_v43, %s2285_s22 }
0x1889   :  { %v933_v33 = vpop.permute.xlu1 %932  ;;  %v731_v34 = vpop.permute.xlu0 %730 }
0x188a   :  { %1828 = vst.msk [vmem:[%s2837_s6 + $0x6] sm:$0x3] %vm28_vm0, %v933_v33  ;;  %1820 = vst.msk [vmem:[%s2837_s6 + $0x4] sm:$0x3] %vm28_vm0, %v731_v34 }
0x188d   :  { %v1337_v37 = vpop.permute.xlu1 %1336  ;;  %v1135_v39 = vpop.permute.xlu0 %1134 }
0x188e   :  { %1844 = vst.msk [vmem:[%s2837_s6 + $0xa] sm:$0x3] %vm28_vm0, %v1337_v37  ;;  %1836 = vst.msk [vmem:[%s2837_s6 + $0x8] sm:$0x3] %vm28_vm0, %v1135_v39 }
0x1891   :  { %v1766_v40 = vpop.permute.xlu1 %1765  ;;  %v1539_v41 = vpop.permute.xlu0 %1538 }
0x1892   :  { %1768 = vst.msk [vmem:[#allocation3] sm:$0x3] %vm28_vm0, %v1766_v40  ;;  %1852 = vst.msk [vmem:[%s2837_s6 + $0xc] sm:$0x3] %vm28_vm0, %v1539_v41 }
0x1895   :  { %v1754_v42 = vpop.permute.xlu0 %1753 }
0x1896   :  { %1756 = vst.msk [vmem:[#allocation2] sm:$0x3] %vm28_vm0, %v1754_v42 }
0x18f4   :  { %v1771_v44 = vpop.permute.xlu0 %1770 }
0x18f5   :  { %1773 = vst.msk [vmem:[#allocation2 + $0x2] sm:$0x3] %vm28_vm0, %v1771_v44  ;;  %v1741_v45 = vpop.permute.xlu1 %1740 }
0x18f6   :  { %1860 = vst.msk [vmem:[%s2837_s6 + $0xe] sm:$0x3] %vm28_vm0, %v1741_v45 }
0x18f9   :  { %v1776_v46 = vpop.permute.xlu1 %1775 }
0x18fa   :  { %1778 = vst.msk [vmem:[#allocation3 + $0x2] sm:$0x3] %vm28_vm0, %v1776_v46 }
0x18fb PF:  {}

</bundles_post_ra>
